<compile_context>
chip_gen: v7x
topology: tpu7x:2x2x1
jax: 0.10.0
libtpu: 0.0.40
codegen_flags: <defaults>
</compile_context>

<pallas_src>
import math

import jax
import jax.numpy as jnp
from jax.experimental import pallas as pl
from jax.experimental.pallas import tpu as pltpu

D_MODEL = 64
D_FF = 1024
LN_EPS = 1e-5
NEG_INF = -1e30


def _round_up(x, m):
    return ((x + m - 1) // m) * m


def _layernorm(x, g, b):
    mu = jnp.mean(x, axis=-1, keepdims=True)
    var = jnp.mean(jnp.square(x - mu), axis=-1, keepdims=True)
    return (x - mu) * jax.lax.rsqrt(var + LN_EPS) * g + b


def _build_kernel(use_mask, matmul_dtype):
    scale = 1.0 / math.sqrt(D_MODEL)
    inv_sqrt2 = 1.0 / math.sqrt(2.0)

    def mm(a, b):
        # casts are no-ops when operands are already matmul_dtype (pre-cast in wrapper)
        return jnp.dot(a.astype(matmul_dtype), b.astype(matmul_dtype),
                       preferred_element_type=jnp.float32)

    def mm_nt(a, b):
        # (M, K) x (N, K) -> (M, N): contraction on last dims (attention scores)
        return jax.lax.dot_general(
            a.astype(matmul_dtype), b.astype(matmul_dtype),
            (((1,), (1,)), ((), ())), preferred_element_type=jnp.float32)

    def attend(q, k_ref, v_ref, mask=None):
        # softmax(q k^T) v with deferred normalization: only the (rows, E)
        # output is scaled by 1/l (EUP approx reciprocal); the big (rows, keys)
        # tensor is never renormalized elementwise.
        s = mm_nt(q, k_ref[...])                                  # (rows, keys) f32
        if mask is not None:
            s = s + mask
        m = jnp.max(s, axis=-1, keepdims=True)
        e = jnp.exp(s - m)
        inv_l = pl.reciprocal(jnp.sum(e, axis=-1, keepdims=True), approx=True)
        return mm(e, v_ref[...]) * inv_l                          # (rows, E) f32

    def kernel(tgt_ref, ks_ref, vs_ref, kc_ref, vc_ref, dpeT_ref, mask_ref,
               wq_s, bq_s, wo_s, bo_s,
               wq_c, bq_c, wo_c, bo_c,
               ln_ref, w1, b1, w2, b2,
               out_ref):
        tgt_tile = tgt_ref[...]                                   # (TQ, E) f32

        # --- self-attention: queries = this tile; keys/values = full sequence ---
        q = (mm(tgt_tile, wq_s[...]) + bq_s[...]) * scale         # scale q, not s
        sa = attend(q, ks_ref, vs_ref,
                    mask=mask_ref[...] if use_mask else None)
        sa = mm(sa, wo_s[...]) + bo_s[...]
        x = _layernorm(tgt_tile + sa, ln_ref[0:1, :], ln_ref[1:2, :])

        # --- cross-attention (memory = dec_feat + scaled pe; K/V projected in wrapper) ---
        qc = (mm(x, wq_c[...]) + bq_c[...]) * scale
        ca = attend(qc, kc_ref, vc_ref)
        ca = mm(ca, wo_c[...]) + bo_c[...]
        x = _layernorm(x + ca, ln_ref[2:3, :], ln_ref[3:4, :])

        # --- feed-forward (exact erf-GELU, like F.gelu default) ---
        h = mm(x, w1[...]) + b1[...]
        h = 0.5 * h * (1.0 + jax.lax.erf(h * inv_sqrt2))
        y = mm(h, w2[...]) + b2[...]
        x = _layernorm(x + y, ln_ref[4:5, :], ln_ref[5:6, :])

        # frames_to_segment_assignment: (TQ, E) @ (E, S_dec_p)
        out_ref[...] = mm(x, dpeT_ref[...]).astype(out_ref.dtype)

    return kernel


def sinusoidal_pos_table(num_positions, embedding_dim=D_MODEL, padding_idx=0):
    # fairseq-style SinusoidalPositionalEmbedding table.
    half_dim = embedding_dim // 2
    emb = math.log(10000.0) / (half_dim - 1)
    emb = jnp.exp(jnp.arange(half_dim, dtype=jnp.float32) * -emb)
    pos = jnp.arange(num_positions, dtype=jnp.float32)[:, None] * emb[None, :]
    table = jnp.concatenate([jnp.sin(pos), jnp.cos(pos)], axis=1)
    table = table.at[padding_idx].set(0.0)
    return table  # (num_positions, embedding_dim)


def init_params(key):
    ks = iter(jax.random.split(key, 16))

    def mat(shape, scale=0.05):
        return (scale * jax.random.normal(next(ks), shape)).astype(jnp.float32)

    def zeros(shape):
        return jnp.zeros(shape, jnp.float32)

    p = {}
    for pfx in ("s", "c"):  # self-attn, cross-attn
        p[f"wq_{pfx}"] = mat((D_MODEL, D_MODEL))
        p[f"bq_{pfx}"] = zeros((1, D_MODEL))
        p[f"wk_{pfx}"] = mat((D_MODEL, D_MODEL))
        p[f"bk_{pfx}"] = zeros((1, D_MODEL))
        p[f"wv_{pfx}"] = mat((D_MODEL, D_MODEL))
        p[f"bv_{pfx}"] = zeros((1, D_MODEL))
        p[f"wo_{pfx}"] = mat((D_MODEL, D_MODEL))
        p[f"bo_{pfx}"] = zeros((1, D_MODEL))
    # layernorm params packed as rows [g1, b1, g2, b2, g3, b3]
    p["ln"] = jnp.stack(
        [jnp.ones(D_MODEL), jnp.zeros(D_MODEL)] * 3).astype(jnp.float32)
    p["w1"] = mat((D_MODEL, D_FF))
    p["b1"] = zeros((1, D_FF))
    p["w2"] = mat((D_FF, D_MODEL))
    p["b2"] = zeros((1, D_MODEL))
    return p


def _vmem_capacity_bytes():
    try:
        info = pltpu.get_tpu_info()
        cap = getattr(info, "vmem_capacity_bytes", None)
        if cap:
            return int(cap)
    except Exception:
        pass
    return 64 * 1024 * 1024  # conservative (v7x-sized) fallback


def _pick_tq(S_enc, vmem_cap):
    if S_enc <= 128:
        return _round_up(max(S_enc, 8), 8)
    if S_enc <= 512 or vmem_cap < 100 * 1024 * 1024:
        return 128           # v7x (64 MiB) or short sequences
    return 256               # v5e/v6e (128 MiB) with long sequences


def decoder_duration_forward(enc_feat, dec_feat, params, add_tgt_pe_dec_dur=1.0,
                             matmul_dtype=jnp.bfloat16):
    """enc_feat: (B, E, S_enc), dec_feat: (B, S_dec, E) -> (B, S_enc, S_dec).

    matmul operands default to bf16 (MXU-native on all current generations);
    accumulation, layernorm, softmax statistics and GELU stay f32. Pass
    matmul_dtype=jnp.float32 for bit-closer parity with the PyTorch reference.
    """
    B, E, S_enc = enc_feat.shape
    _, S_dec, _ = dec_feat.shape
    assert E == D_MODEL and S_dec >= 1

    vmem_cap = _vmem_capacity_bytes()
    TQ = _pick_tq(S_enc, vmem_cap)
    S_enc_p = _round_up(S_enc, TQ)
    nQ = S_enc_p // TQ
    # lane-dense padding of the output only when S_dec is genuinely wide;
    # small S_dec stays unpadded (less HBM writeback, no wrapper slice copy).
    S_dec_p = _round_up(S_dec, 128) if S_dec > 128 else S_dec

    # positional embedding for positions 1..S_dec (all-ones tokens, padding_idx=0);
    # table extended beyond the 2*40 init size if S_dec requires it (fairseq-style).
    table = sinusoidal_pos_table(max(2 * 40, S_dec + 1))
    pe = table[1:S_dec + 1]                                          # (S_dec, E)

    f32 = jnp.float32
    # wrapper-side layout plumbing (one-time XLA ops):
    tgt = jnp.transpose(enc_feat, (0, 2, 1)).astype(f32)             # (B, S_enc, E)
    tgt_p = jnp.pad(tgt, ((0, 0), (0, S_enc_p - S_enc), (0, 0)))
    mem = dec_feat.astype(f32) + pe[None, :, :] * add_tgt_pe_dec_dur
    decpe = dec_feat.astype(f32) + pe[None, :, :]
    decpe_p = jnp.pad(decpe, ((0, 0), (0, S_dec_p - S_dec), (0, 0)))
    decpe_T = jnp.transpose(decpe_p, (0, 2, 1)).astype(matmul_dtype)  # (B, E, S_dec_p)

    # hoisted K/V projections (once per batch element, outside the grid) so the
    # query-tile axis carries no shared state and can run fully parallel.
    ks = (tgt_p @ params["wk_s"] + params["bk_s"]).astype(matmul_dtype)   # (B, S_enc_p, E)
    vs = (tgt_p @ params["wv_s"] + params["bv_s"]).astype(matmul_dtype)
    kc = (mem @ params["wk_c"] + params["bk_c"]).astype(matmul_dtype)     # (B, S_dec, E)
    vc = (mem @ params["wv_c"] + params["bv_c"]).astype(matmul_dtype)

    # additive mask for padded key columns (built once, reused by every tile)
    mask = jnp.where(jnp.arange(S_enc_p) < S_enc, 0.0, NEG_INF).astype(f32)[None, :]
    use_mask = S_enc_p != S_enc

    # pre-cast matmul weights once; biases / LN params stay f32 (applied to
    # the f32 accumulator).
    cast = lambda w: w.astype(matmul_dtype)
    weights = [
        cast(params["wq_s"]), params["bq_s"], cast(params["wo_s"]), params["bo_s"],
        cast(params["wq_c"]), params["bq_c"], cast(params["wo_c"]), params["bo_c"],
        params["ln"],
        cast(params["w1"]), params["b1"], cast(params["w2"]), params["b2"],
    ]

    in_specs = [
        pl.BlockSpec((None, TQ, E), lambda b, q: (b, q, 0)),        # tgt query tile
        pl.BlockSpec((None, S_enc_p, E), lambda b, q: (b, 0, 0)),   # self-attn K
        pl.BlockSpec((None, S_enc_p, E), lambda b, q: (b, 0, 0)),   # self-attn V
        pl.BlockSpec((None, S_dec, E), lambda b, q: (b, 0, 0)),     # cross-attn K
        pl.BlockSpec((None, S_dec, E), lambda b, q: (b, 0, 0)),     # cross-attn V
        pl.BlockSpec((None, E, S_dec_p), lambda b, q: (b, 0, 0)),   # (dec_feat+pe)^T
        pl.BlockSpec((1, S_enc_p), lambda b, q: (0, 0)),            # key mask
    ] + [
        pl.BlockSpec(w.shape, lambda b, q, n=w.ndim: (0,) * n) for w in weights
    ]

    kernel = _build_kernel(use_mask, matmul_dtype)

    vmem_limit = max(32 * 1024 * 1024,
                     min(int(vmem_cap * 3 // 4), 112 * 1024 * 1024))

    out_p = pl.pallas_call(
        kernel,
        out_shape=jax.ShapeDtypeStruct((B, S_enc_p, S_dec_p), jnp.float32),
        grid_spec=pltpu.PrefetchScalarGridSpec(
            num_scalar_prefetch=0,
            grid=(B, nQ),
            in_specs=in_specs,
            out_specs=pl.BlockSpec((None, TQ, S_dec_p), lambda b, q: (b, q, 0)),
        ),
        compiler_params=pltpu.CompilerParams(
            dimension_semantics=("parallel", "parallel"),
            vmem_limit_bytes=vmem_limit),
    )(tgt_p, ks, vs, kc, vc, decpe_T, mask, *weights)

    # slice off padding (no-op when nothing was padded)
    return out_p[:, :S_enc, :S_dec]


# TODO(synk): remove_duplicates() (data-dependent Python-dict dedup + random.choice,
# only active when no_split_data is not None) has no clean Pallas equivalent; the
# implemented path is the no_split_data=None inference branch.
# TODO(synk): num_layers_trf_dec_dur_pytorch > 1 would simply loop this decoder
# layer; a single layer is implemented here.

if __name__ == "__main__":
    key = jax.random.PRNGKey(0)
    B, S_enc, S_dec, E = 2, 16, 8, D_MODEL
    k1, k2, k3 = jax.random.split(key, 3)
    enc_feat = jax.random.normal(k1, (B, E, S_enc), dtype=jnp.float32)   # 'B E S'
    dec_feat = jax.random.normal(k2, (B, S_dec, E), dtype=jnp.float32)   # 'B S E'
    params = init_params(k3)

    out = decoder_duration_forward(enc_feat, dec_feat, params,
                                   add_tgt_pe_dec_dur=1.0)
    jax.block_until_ready(out)
    assert out.shape == (B, S_enc, S_dec) and out.dtype == jnp.float32
    print("KERNEL_OK")
</pallas_src>

<mosaic_0001>
module attributes {stable_mosaic.version = 11 : i64} {
  func.func @kernel(%arg0: i32, %arg1: i32, %arg2: memref<1x16x64xf32, #tpu.memory_space<vmem>>, %arg3: memref<1x16x64xbf16, #tpu.memory_space<vmem>>, %arg4: memref<1x16x64xbf16, #tpu.memory_space<vmem>>, %arg5: memref<1x8x64xbf16, #tpu.memory_space<vmem>>, %arg6: memref<1x8x64xbf16, #tpu.memory_space<vmem>>, %arg7: memref<1x64x8xbf16, #tpu.memory_space<vmem>>, %arg8: memref<1x16xf32, #tpu.memory_space<vmem>>, %arg9: memref<64x64xbf16, #tpu.memory_space<vmem>>, %arg10: memref<1x64xf32, #tpu.memory_space<vmem>>, %arg11: memref<64x64xbf16, #tpu.memory_space<vmem>>, %arg12: memref<1x64xf32, #tpu.memory_space<vmem>>, %arg13: memref<64x64xbf16, #tpu.memory_space<vmem>>, %arg14: memref<1x64xf32, #tpu.memory_space<vmem>>, %arg15: memref<64x64xbf16, #tpu.memory_space<vmem>>, %arg16: memref<1x64xf32, #tpu.memory_space<vmem>>, %arg17: memref<6x64xf32, #tpu.memory_space<vmem>>, %arg18: memref<64x1024xbf16, #tpu.memory_space<vmem>>, %arg19: memref<1x1024xf32, #tpu.memory_space<vmem>>, %arg20: memref<1024x64xbf16, #tpu.memory_space<vmem>>, %arg21: memref<1x64xf32, #tpu.memory_space<vmem>>, %arg22: memref<1x16x8xf32, #tpu.memory_space<vmem>>) attributes {dimension_semantics = [#tpu.dimension_semantics<parallel>, #tpu.dimension_semantics<parallel>], iteration_bounds = array<i64: 2, 1>, scalar_prefetch = 0 : i64, scratch_operands = 0 : i64, tpu.core_type = #tpu.core_type<tc>, window_params = [{transform_indices = @transform_0, window_bounds = array<i64: 1, 16, 64>}, {transform_indices = @transform_1, window_bounds = array<i64: 1, 16, 64>}, {transform_indices = @transform_2, window_bounds = array<i64: 1, 16, 64>}, {transform_indices = @transform_3, window_bounds = array<i64: 1, 8, 64>}, {transform_indices = @transform_4, window_bounds = array<i64: 1, 8, 64>}, {transform_indices = @transform_5, window_bounds = array<i64: 1, 64, 8>}, {pipeline_mode = #tpu.pipeline_mode<synchronous>, transform_indices = @transform_6, window_bounds = array<i64: 1, 16>}, {pipeline_mode = #tpu.pipeline_mode<synchronous>, transform_indices = @transform_7, window_bounds = array<i64: 64, 64>}, {pipeline_mode = #tpu.pipeline_mode<synchronous>, transform_indices = @transform_8, window_bounds = array<i64: 1, 64>}, {pipeline_mode = #tpu.pipeline_mode<synchronous>, transform_indices = @transform_9, window_bounds = array<i64: 64, 64>}, {pipeline_mode = #tpu.pipeline_mode<synchronous>, transform_indices = @transform_10, window_bounds = array<i64: 1, 64>}, {pipeline_mode = #tpu.pipeline_mode<synchronous>, transform_indices = @transform_11, window_bounds = array<i64: 64, 64>}, {pipeline_mode = #tpu.pipeline_mode<synchronous>, transform_indices = @transform_12, window_bounds = array<i64: 1, 64>}, {pipeline_mode = #tpu.pipeline_mode<synchronous>, transform_indices = @transform_13, window_bounds = array<i64: 64, 64>}, {pipeline_mode = #tpu.pipeline_mode<synchronous>, transform_indices = @transform_14, window_bounds = array<i64: 1, 64>}, {pipeline_mode = #tpu.pipeline_mode<synchronous>, transform_indices = @transform_15, window_bounds = array<i64: 6, 64>}, {pipeline_mode = #tpu.pipeline_mode<synchronous>, transform_indices = @transform_16, window_bounds = array<i64: 64, 1024>}, {pipeline_mode = #tpu.pipeline_mode<synchronous>, transform_indices = @transform_17, window_bounds = array<i64: 1, 1024>}, {pipeline_mode = #tpu.pipeline_mode<synchronous>, transform_indices = @transform_18, window_bounds = array<i64: 1024, 64>}, {pipeline_mode = #tpu.pipeline_mode<synchronous>, transform_indices = @transform_19, window_bounds = array<i64: 1, 64>}, {transform_indices = @transform_20, window_bounds = array<i64: 1, 16, 8>}]} {
    %c0 = arith.constant 0 : index
    %c0_0 = arith.constant 0 : index
    %c0_1 = arith.constant 0 : index
    %0 = vector.load %arg2[%c0, %c0_0, %c0_1] : memref<1x16x64xf32, #tpu.memory_space<vmem>>, vector<1x16x64xf32>
    %1 = vector.shape_cast %0 : vector<1x16x64xf32> to vector<16x64xf32>
    %c0_2 = arith.constant 0 : index
    %c0_3 = arith.constant 0 : index
    %2 = vector.load %arg9[%c0_2, %c0_3] : memref<64x64xbf16, #tpu.memory_space<vmem>>, vector<64x64xbf16>
    %3 = arith.truncf %1 : vector<16x64xf32> to vector<16x64xbf16>
    %cst = arith.constant dense<0.000000e+00> : vector<16x64xf32>
    %4 = tpu.matmul %3, %2, %cst {dimension_numbers = #tpu.dot_dimension_numbers<[1], [0], [0], [1], [0, 0, 1, 1], [], []>} : vector<16x64xbf16>, vector<64x64xbf16>, vector<16x64xf32> -> vector<16x64xf32>
    %c0_4 = arith.constant 0 : index
    %c0_5 = arith.constant 0 : index
    %5 = vector.load %arg10[%c0_4, %c0_5] : memref<1x64xf32, #tpu.memory_space<vmem>>, vector<1x64xf32>
    %6 = vector.broadcast %5 : vector<1x64xf32> to vector<16x64xf32>
    %7 = arith.addf %4, %6 : vector<16x64xf32>
    %cst_6 = arith.constant 1.250000e-01 : f32
    %8 = vector.broadcast %cst_6 : f32 to vector<16x64xf32>
    %9 = arith.mulf %7, %8 : vector<16x64xf32>
    %c0_7 = arith.constant 0 : index
    %c0_8 = arith.constant 0 : index
    %c0_9 = arith.constant 0 : index
    %10 = vector.load %arg3[%c0_7, %c0_8, %c0_9] : memref<1x16x64xbf16, #tpu.memory_space<vmem>>, vector<1x16x64xbf16>
    %11 = vector.shape_cast %10 : vector<1x16x64xbf16> to vector<16x64xbf16>
    %12 = arith.truncf %9 : vector<16x64xf32> to vector<16x64xbf16>
    %cst_10 = arith.constant dense<0.000000e+00> : vector<16x16xf32>
    %13 = tpu.matmul %12, %11, %cst_10 {dimension_numbers = #tpu.dot_dimension_numbers<[1], [1], [0], [0], [0, 0, 1, 0], [], []>} : vector<16x64xbf16>, vector<16x64xbf16>, vector<16x16xf32> -> vector<16x16xf32>
    %cst_11 = arith.constant dense<0xFF800000> : vector<16xf32>
    %14 = vector.multi_reduction <maximumf>, %13, %cst_11 [1] : vector<16x16xf32> to vector<16xf32>
    %15 = vector.shape_cast %14 : vector<16xf32> to vector<16x1xf32>
    %16 = vector.broadcast %15 : vector<16x1xf32> to vector<16x16xf32>
    %17 = arith.subf %13, %16 : vector<16x16xf32>
    %18 = math.exp %17 : vector<16x16xf32>
    %cst_12 = arith.constant dense<0.000000e+00> : vector<16xf32>
    %19 = vector.multi_reduction <add>, %18, %cst_12 [1] : vector<16x16xf32> to vector<16xf32>
    %20 = vector.shape_cast %19 : vector<16xf32> to vector<16x1xf32>
    %21 = tpu.reciprocal %20 {approx = true} : vector<16x1xf32> -> vector<16x1xf32>
    %c0_13 = arith.constant 0 : index
    %c0_14 = arith.constant 0 : index
    %c0_15 = arith.constant 0 : index
    %22 = vector.load %arg4[%c0_13, %c0_14, %c0_15] : memref<1x16x64xbf16, #tpu.memory_space<vmem>>, vector<1x16x64xbf16>
    %23 = vector.shape_cast %22 : vector<1x16x64xbf16> to vector<16x64xbf16>
    %24 = arith.truncf %18 : vector<16x16xf32> to vector<16x16xbf16>
    %cst_16 = arith.constant dense<0.000000e+00> : vector<16x64xf32>
    %25 = tpu.matmul %24, %23, %cst_16 {dimension_numbers = #tpu.dot_dimension_numbers<[1], [0], [0], [1], [0, 0, 1, 1], [], []>} : vector<16x16xbf16>, vector<16x64xbf16>, vector<16x64xf32> -> vector<16x64xf32>
    %26 = vector.broadcast %21 : vector<16x1xf32> to vector<16x64xf32>
    %27 = arith.mulf %25, %26 : vector<16x64xf32>
    %c0_17 = arith.constant 0 : index
    %c0_18 = arith.constant 0 : index
    %28 = vector.load %arg11[%c0_17, %c0_18] : memref<64x64xbf16, #tpu.memory_space<vmem>>, vector<64x64xbf16>
    %29 = arith.truncf %27 : vector<16x64xf32> to vector<16x64xbf16>
    %cst_19 = arith.constant dense<0.000000e+00> : vector<16x64xf32>
    %30 = tpu.matmul %29, %28, %cst_19 {dimension_numbers = #tpu.dot_dimension_numbers<[1], [0], [0], [1], [0, 0, 1, 1], [], []>} : vector<16x64xbf16>, vector<64x64xbf16>, vector<16x64xf32> -> vector<16x64xf32>
    %c0_20 = arith.constant 0 : index
    %c0_21 = arith.constant 0 : index
    %31 = vector.load %arg12[%c0_20, %c0_21] : memref<1x64xf32, #tpu.memory_space<vmem>>, vector<1x64xf32>
    %32 = vector.broadcast %31 : vector<1x64xf32> to vector<16x64xf32>
    %33 = arith.addf %30, %32 : vector<16x64xf32>
    %34 = arith.addf %1, %33 : vector<16x64xf32>
    %c0_22 = arith.constant 0 : index
    %c0_23 = arith.constant 0 : index
    %35 = vector.load %arg17[%c0_22, %c0_23] : memref<6x64xf32, #tpu.memory_space<vmem>>, vector<1x64xf32>
    %c1 = arith.constant 1 : index
    %c0_24 = arith.constant 0 : index
    %36 = vector.load %arg17[%c1, %c0_24] : memref<6x64xf32, #tpu.memory_space<vmem>>, vector<1x64xf32>
    %cst_25 = arith.constant dense<0.000000e+00> : vector<16xf32>
    %37 = vector.multi_reduction <add>, %34, %cst_25 [1] : vector<16x64xf32> to vector<16xf32>
    %38 = vector.shape_cast %37 : vector<16xf32> to vector<16x1xf32>
    %cst_26 = arith.constant 6.400000e+01 : f32
    %39 = vector.broadcast %cst_26 : f32 to vector<16x1xf32>
    %40 = arith.divf %38, %39 : vector<16x1xf32>
    %41 = vector.broadcast %40 : vector<16x1xf32> to vector<16x64xf32>
    %42 = arith.subf %34, %41 : vector<16x64xf32>
    %43 = arith.mulf %42, %42 : vector<16x64xf32>
    %cst_27 = arith.constant dense<0.000000e+00> : vector<16xf32>
    %44 = vector.multi_reduction <add>, %43, %cst_27 [1] : vector<16x64xf32> to vector<16xf32>
    %45 = vector.shape_cast %44 : vector<16xf32> to vector<16x1xf32>
    %cst_28 = arith.constant 6.400000e+01 : f32
    %46 = vector.broadcast %cst_28 : f32 to vector<16x1xf32>
    %47 = arith.divf %45, %46 : vector<16x1xf32>
    %48 = vector.broadcast %40 : vector<16x1xf32> to vector<16x64xf32>
    %49 = arith.subf %34, %48 : vector<16x64xf32>
    %cst_29 = arith.constant 9.99999974E-6 : f32
    %50 = vector.broadcast %cst_29 : f32 to vector<16x1xf32>
    %51 = arith.addf %47, %50 : vector<16x1xf32>
    %52 = math.rsqrt %51 : vector<16x1xf32>
    %53 = vector.broadcast %52 : vector<16x1xf32> to vector<16x64xf32>
    %54 = arith.mulf %49, %53 : vector<16x64xf32>
    %55 = vector.broadcast %35 : vector<1x64xf32> to vector<16x64xf32>
    %56 = arith.mulf %54, %55 : vector<16x64xf32>
    %57 = vector.broadcast %36 : vector<1x64xf32> to vector<16x64xf32>
    %58 = arith.addf %56, %57 : vector<16x64xf32>
    %c0_30 = arith.constant 0 : index
    %c0_31 = arith.constant 0 : index
    %59 = vector.load %arg13[%c0_30, %c0_31] : memref<64x64xbf16, #tpu.memory_space<vmem>>, vector<64x64xbf16>
    %60 = arith.truncf %58 : vector<16x64xf32> to vector<16x64xbf16>
    %cst_32 = arith.constant dense<0.000000e+00> : vector<16x64xf32>
    %61 = tpu.matmul %60, %59, %cst_32 {dimension_numbers = #tpu.dot_dimension_numbers<[1], [0], [0], [1], [0, 0, 1, 1], [], []>} : vector<16x64xbf16>, vector<64x64xbf16>, vector<16x64xf32> -> vector<16x64xf32>
    %c0_33 = arith.constant 0 : index
    %c0_34 = arith.constant 0 : index
    %62 = vector.load %arg14[%c0_33, %c0_34] : memref<1x64xf32, #tpu.memory_space<vmem>>, vector<1x64xf32>
    %63 = vector.broadcast %62 : vector<1x64xf32> to vector<16x64xf32>
    %64 = arith.addf %61, %63 : vector<16x64xf32>
    %cst_35 = arith.constant 1.250000e-01 : f32
    %65 = vector.broadcast %cst_35 : f32 to vector<16x64xf32>
    %66 = arith.mulf %64, %65 : vector<16x64xf32>
    %c0_36 = arith.constant 0 : index
    %c0_37 = arith.constant 0 : index
    %c0_38 = arith.constant 0 : index
    %67 = vector.load %arg5[%c0_36, %c0_37, %c0_38] : memref<1x8x64xbf16, #tpu.memory_space<vmem>>, vector<1x8x64xbf16>
    %68 = vector.shape_cast %67 : vector<1x8x64xbf16> to vector<8x64xbf16>
    %69 = arith.truncf %66 : vector<16x64xf32> to vector<16x64xbf16>
    %cst_39 = arith.constant dense<0.000000e+00> : vector<16x8xf32>
    %70 = tpu.matmul %69, %68, %cst_39 {dimension_numbers = #tpu.dot_dimension_numbers<[1], [1], [0], [0], [0, 0, 1, 0], [], []>} : vector<16x64xbf16>, vector<8x64xbf16>, vector<16x8xf32> -> vector<16x8xf32>
    %cst_40 = arith.constant dense<0xFF800000> : vector<16xf32>
    %71 = vector.multi_reduction <maximumf>, %70, %cst_40 [1] : vector<16x8xf32> to vector<16xf32>
    %72 = vector.shape_cast %71 : vector<16xf32> to vector<16x1xf32>
    %73 = vector.broadcast %72 : vector<16x1xf32> to vector<16x8xf32>
    %74 = arith.subf %70, %73 : vector<16x8xf32>
    %75 = math.exp %74 : vector<16x8xf32>
    %cst_41 = arith.constant dense<0.000000e+00> : vector<16xf32>
    %76 = vector.multi_reduction <add>, %75, %cst_41 [1] : vector<16x8xf32> to vector<16xf32>
    %77 = vector.shape_cast %76 : vector<16xf32> to vector<16x1xf32>
    %78 = tpu.reciprocal %77 {approx = true} : vector<16x1xf32> -> vector<16x1xf32>
    %c0_42 = arith.constant 0 : index
    %c0_43 = arith.constant 0 : index
    %c0_44 = arith.constant 0 : index
    %79 = vector.load %arg6[%c0_42, %c0_43, %c0_44] : memref<1x8x64xbf16, #tpu.memory_space<vmem>>, vector<1x8x64xbf16>
    %80 = vector.shape_cast %79 : vector<1x8x64xbf16> to vector<8x64xbf16>
    %81 = arith.truncf %75 : vector<16x8xf32> to vector<16x8xbf16>
    %cst_45 = arith.constant dense<0.000000e+00> : vector<16x64xf32>
    %82 = tpu.matmul %81, %80, %cst_45 {dimension_numbers = #tpu.dot_dimension_numbers<[1], [0], [0], [1], [0, 0, 1, 1], [], []>} : vector<16x8xbf16>, vector<8x64xbf16>, vector<16x64xf32> -> vector<16x64xf32>
    %83 = vector.broadcast %78 : vector<16x1xf32> to vector<16x64xf32>
    %84 = arith.mulf %82, %83 : vector<16x64xf32>
    %c0_46 = arith.constant 0 : index
    %c0_47 = arith.constant 0 : index
    %85 = vector.load %arg15[%c0_46, %c0_47] : memref<64x64xbf16, #tpu.memory_space<vmem>>, vector<64x64xbf16>
    %86 = arith.truncf %84 : vector<16x64xf32> to vector<16x64xbf16>
    %cst_48 = arith.constant dense<0.000000e+00> : vector<16x64xf32>
    %87 = tpu.matmul %86, %85, %cst_48 {dimension_numbers = #tpu.dot_dimension_numbers<[1], [0], [0], [1], [0, 0, 1, 1], [], []>} : vector<16x64xbf16>, vector<64x64xbf16>, vector<16x64xf32> -> vector<16x64xf32>
    %c0_49 = arith.constant 0 : index
    %c0_50 = arith.constant 0 : index
    %88 = vector.load %arg16[%c0_49, %c0_50] : memref<1x64xf32, #tpu.memory_space<vmem>>, vector<1x64xf32>
    %89 = vector.broadcast %88 : vector<1x64xf32> to vector<16x64xf32>
    %90 = arith.addf %87, %89 : vector<16x64xf32>
    %91 = arith.addf %58, %90 : vector<16x64xf32>
    %c2 = arith.constant 2 : index
    %c0_51 = arith.constant 0 : index
    %92 = vector.load %arg17[%c2, %c0_51] : memref<6x64xf32, #tpu.memory_space<vmem>>, vector<1x64xf32>
    %c3 = arith.constant 3 : index
    %c0_52 = arith.constant 0 : index
    %93 = vector.load %arg17[%c3, %c0_52] : memref<6x64xf32, #tpu.memory_space<vmem>>, vector<1x64xf32>
    %cst_53 = arith.constant dense<0.000000e+00> : vector<16xf32>
    %94 = vector.multi_reduction <add>, %91, %cst_53 [1] : vector<16x64xf32> to vector<16xf32>
    %95 = vector.shape_cast %94 : vector<16xf32> to vector<16x1xf32>
    %cst_54 = arith.constant 6.400000e+01 : f32
    %96 = vector.broadcast %cst_54 : f32 to vector<16x1xf32>
    %97 = arith.divf %95, %96 : vector<16x1xf32>
    %98 = vector.broadcast %97 : vector<16x1xf32> to vector<16x64xf32>
    %99 = arith.subf %91, %98 : vector<16x64xf32>
    %100 = arith.mulf %99, %99 : vector<16x64xf32>
    %cst_55 = arith.constant dense<0.000000e+00> : vector<16xf32>
    %101 = vector.multi_reduction <add>, %100, %cst_55 [1] : vector<16x64xf32> to vector<16xf32>
    %102 = vector.shape_cast %101 : vector<16xf32> to vector<16x1xf32>
    %cst_56 = arith.constant 6.400000e+01 : f32
    %103 = vector.broadcast %cst_56 : f32 to vector<16x1xf32>
    %104 = arith.divf %102, %103 : vector<16x1xf32>
    %105 = vector.broadcast %97 : vector<16x1xf32> to vector<16x64xf32>
    %106 = arith.subf %91, %105 : vector<16x64xf32>
    %cst_57 = arith.constant 9.99999974E-6 : f32
    %107 = vector.broadcast %cst_57 : f32 to vector<16x1xf32>
    %108 = arith.addf %104, %107 : vector<16x1xf32>
    %109 = math.rsqrt %108 : vector<16x1xf32>
    %110 = vector.broadcast %109 : vector<16x1xf32> to vector<16x64xf32>
    %111 = arith.mulf %106, %110 : vector<16x64xf32>
    %112 = vector.broadcast %92 : vector<1x64xf32> to vector<16x64xf32>
    %113 = arith.mulf %111, %112 : vector<16x64xf32>
    %114 = vector.broadcast %93 : vector<1x64xf32> to vector<16x64xf32>
    %115 = arith.addf %113, %114 : vector<16x64xf32>
    %c0_58 = arith.constant 0 : index
    %c0_59 = arith.constant 0 : index
    %116 = vector.load %arg18[%c0_58, %c0_59] : memref<64x1024xbf16, #tpu.memory_space<vmem>>, vector<64x1024xbf16>
    %117 = arith.truncf %115 : vector<16x64xf32> to vector<16x64xbf16>
    %cst_60 = arith.constant dense<0.000000e+00> : vector<16x1024xf32>
    %118 = tpu.matmul %117, %116, %cst_60 {dimension_numbers = #tpu.dot_dimension_numbers<[1], [0], [0], [1], [0, 0, 1, 1], [], []>} : vector<16x64xbf16>, vector<64x1024xbf16>, vector<16x1024xf32> -> vector<16x1024xf32>
    %c0_61 = arith.constant 0 : index
    %c0_62 = arith.constant 0 : index
    %119 = vector.load %arg19[%c0_61, %c0_62] : memref<1x1024xf32, #tpu.memory_space<vmem>>, vector<1x1024xf32>
    %120 = vector.broadcast %119 : vector<1x1024xf32> to vector<16x1024xf32>
    %121 = arith.addf %118, %120 : vector<16x1024xf32>
    %cst_63 = arith.constant 5.000000e-01 : f32
    %122 = vector.broadcast %cst_63 : f32 to vector<16x1024xf32>
    %123 = arith.mulf %122, %121 : vector<16x1024xf32>
    %cst_64 = arith.constant 0.707106769 : f32
    %124 = vector.broadcast %cst_64 : f32 to vector<16x1024xf32>
    %125 = arith.mulf %121, %124 : vector<16x1024xf32>
    %126 = math.erf %125 : vector<16x1024xf32>
    %cst_65 = arith.constant 1.000000e+00 : f32
    %127 = vector.broadcast %cst_65 : f32 to vector<16x1024xf32>
    %128 = arith.addf %127, %126 : vector<16x1024xf32>
    %129 = arith.mulf %123, %128 : vector<16x1024xf32>
    %c0_66 = arith.constant 0 : index
    %c0_67 = arith.constant 0 : index
    %130 = vector.load %arg20[%c0_66, %c0_67] : memref<1024x64xbf16, #tpu.memory_space<vmem>>, vector<1024x64xbf16>
    %131 = arith.truncf %129 : vector<16x1024xf32> to vector<16x1024xbf16>
    %cst_68 = arith.constant dense<0.000000e+00> : vector<16x64xf32>
    %132 = tpu.matmul %131, %130, %cst_68 {dimension_numbers = #tpu.dot_dimension_numbers<[1], [0], [0], [1], [0, 0, 1, 1], [], []>} : vector<16x1024xbf16>, vector<1024x64xbf16>, vector<16x64xf32> -> vector<16x64xf32>
    %c0_69 = arith.constant 0 : index
    %c0_70 = arith.constant 0 : index
    %133 = vector.load %arg21[%c0_69, %c0_70] : memref<1x64xf32, #tpu.memory_space<vmem>>, vector<1x64xf32>
    %134 = vector.broadcast %133 : vector<1x64xf32> to vector<16x64xf32>
    %135 = arith.addf %132, %134 : vector<16x64xf32>
    %136 = arith.addf %115, %135 : vector<16x64xf32>
    %c4 = arith.constant 4 : index
    %c0_71 = arith.constant 0 : index
    %137 = vector.load %arg17[%c4, %c0_71] : memref<6x64xf32, #tpu.memory_space<vmem>>, vector<1x64xf32>
    %c5 = arith.constant 5 : index
    %c0_72 = arith.constant 0 : index
    %138 = vector.load %arg17[%c5, %c0_72] : memref<6x64xf32, #tpu.memory_space<vmem>>, vector<1x64xf32>
    %cst_73 = arith.constant dense<0.000000e+00> : vector<16xf32>
    %139 = vector.multi_reduction <add>, %136, %cst_73 [1] : vector<16x64xf32> to vector<16xf32>
    %140 = vector.shape_cast %139 : vector<16xf32> to vector<16x1xf32>
    %cst_74 = arith.constant 6.400000e+01 : f32
    %141 = vector.broadcast %cst_74 : f32 to vector<16x1xf32>
    %142 = arith.divf %140, %141 : vector<16x1xf32>
    %143 = vector.broadcast %142 : vector<16x1xf32> to vector<16x64xf32>
    %144 = arith.subf %136, %143 : vector<16x64xf32>
    %145 = arith.mulf %144, %144 : vector<16x64xf32>
    %cst_75 = arith.constant dense<0.000000e+00> : vector<16xf32>
    %146 = vector.multi_reduction <add>, %145, %cst_75 [1] : vector<16x64xf32> to vector<16xf32>
    %147 = vector.shape_cast %146 : vector<16xf32> to vector<16x1xf32>
    %cst_76 = arith.constant 6.400000e+01 : f32
    %148 = vector.broadcast %cst_76 : f32 to vector<16x1xf32>
    %149 = arith.divf %147, %148 : vector<16x1xf32>
    %150 = vector.broadcast %142 : vector<16x1xf32> to vector<16x64xf32>
    %151 = arith.subf %136, %150 : vector<16x64xf32>
    %cst_77 = arith.constant 9.99999974E-6 : f32
    %152 = vector.broadcast %cst_77 : f32 to vector<16x1xf32>
    %153 = arith.addf %149, %152 : vector<16x1xf32>
    %154 = math.rsqrt %153 : vector<16x1xf32>
    %155 = vector.broadcast %154 : vector<16x1xf32> to vector<16x64xf32>
    %156 = arith.mulf %151, %155 : vector<16x64xf32>
    %157 = vector.broadcast %137 : vector<1x64xf32> to vector<16x64xf32>
    %158 = arith.mulf %156, %157 : vector<16x64xf32>
    %159 = vector.broadcast %138 : vector<1x64xf32> to vector<16x64xf32>
    %160 = arith.addf %158, %159 : vector<16x64xf32>
    %c0_78 = arith.constant 0 : index
    %c0_79 = arith.constant 0 : index
    %c0_80 = arith.constant 0 : index
    %161 = vector.load %arg7[%c0_78, %c0_79, %c0_80] : memref<1x64x8xbf16, #tpu.memory_space<vmem>>, vector<1x64x8xbf16>
    %162 = vector.shape_cast %161 : vector<1x64x8xbf16> to vector<64x8xbf16>
    %163 = arith.truncf %160 : vector<16x64xf32> to vector<16x64xbf16>
    %cst_81 = arith.constant dense<0.000000e+00> : vector<16x8xf32>
    %164 = tpu.matmul %163, %162, %cst_81 {dimension_numbers = #tpu.dot_dimension_numbers<[1], [0], [0], [1], [0, 0, 1, 1], [], []>} : vector<16x64xbf16>, vector<64x8xbf16>, vector<16x8xf32> -> vector<16x8xf32>
    %c0_82 = arith.constant 0 : index
    %c0_83 = arith.constant 0 : index
    %c0_84 = arith.constant 0 : index
    %165 = vector.load %arg22[%c0_82, %c0_83, %c0_84] : memref<1x16x8xf32, #tpu.memory_space<vmem>>, vector<1x16x8xf32>
    %166 = vector.shape_cast %165 : vector<1x16x8xf32> to vector<16x8xf32>
    %167 = vector.shape_cast %164 : vector<16x8xf32> to vector<1x16x8xf32>
    tpu.vector_store %arg22[%c0_82, %c0_83, %c0_84], %167 {strides = array<i32>} : memref<1x16x8xf32, #tpu.memory_space<vmem>>, vector<1x16x8xf32>,
    return
  }
  func.func @transform_0(%arg0: i32, %arg1: i32) -> (i32, i32, i32) {
    %c0_i32 = arith.constant 0 : i32
    %c0_i32_0 = arith.constant 0 : i32
    return %arg0, %arg1, %c0_i32 : i32, i32, i32
  }
  func.func @transform_1(%arg0: i32, %arg1: i32) -> (i32, i32, i32) {
    %c0_i32 = arith.constant 0 : i32
    %c0_i32_0 = arith.constant 0 : i32
    %c0_i32_1 = arith.constant 0 : i32
    return %arg0, %c0_i32, %c0_i32_0 : i32, i32, i32
  }
  func.func @transform_2(%arg0: i32, %arg1: i32) -> (i32, i32, i32) {
    %c0_i32 = arith.constant 0 : i32
    %c0_i32_0 = arith.constant 0 : i32
    %c0_i32_1 = arith.constant 0 : i32
    return %arg0, %c0_i32, %c0_i32_0 : i32, i32, i32
  }
  func.func @transform_3(%arg0: i32, %arg1: i32) -> (i32, i32, i32) {
    %c0_i32 = arith.constant 0 : i32
    %c0_i32_0 = arith.constant 0 : i32
    %c0_i32_1 = arith.constant 0 : i32
    return %arg0, %c0_i32, %c0_i32_0 : i32, i32, i32
  }
  func.func @transform_4(%arg0: i32, %arg1: i32) -> (i32, i32, i32) {
    %c0_i32 = arith.constant 0 : i32
    %c0_i32_0 = arith.constant 0 : i32
    %c0_i32_1 = arith.constant 0 : i32
    return %arg0, %c0_i32, %c0_i32_0 : i32, i32, i32
  }
  func.func @transform_5(%arg0: i32, %arg1: i32) -> (i32, i32, i32) {
    %c0_i32 = arith.constant 0 : i32
    %c0_i32_0 = arith.constant 0 : i32
    %c0_i32_1 = arith.constant 0 : i32
    return %arg0, %c0_i32, %c0_i32_0 : i32, i32, i32
  }
  func.func @transform_6(%arg0: i32, %arg1: i32) -> (i32, i32) {
    %c0_i32 = arith.constant 0 : i32
    %c0_i32_0 = arith.constant 0 : i32
    %c0_i32_1 = arith.constant 0 : i32
    return %c0_i32, %c0_i32_0 : i32, i32
  }
  func.func @transform_7(%arg0: i32, %arg1: i32) -> (i32, i32) {
    %c0_i32 = arith.constant 0 : i32
    %c0_i32_0 = arith.constant 0 : i32
    %c0_i32_1 = arith.constant 0 : i32
    return %c0_i32, %c0_i32_0 : i32, i32
  }
  func.func @transform_8(%arg0: i32, %arg1: i32) -> (i32, i32) {
    %c0_i32 = arith.constant 0 : i32
    %c0_i32_0 = arith.constant 0 : i32
    %c0_i32_1 = arith.constant 0 : i32
    return %c0_i32, %c0_i32_0 : i32, i32
  }
  func.func @transform_9(%arg0: i32, %arg1: i32) -> (i32, i32) {
    %c0_i32 = arith.constant 0 : i32
    %c0_i32_0 = arith.constant 0 : i32
    %c0_i32_1 = arith.constant 0 : i32
    return %c0_i32, %c0_i32_0 : i32, i32
  }
  func.func @transform_10(%arg0: i32, %arg1: i32) -> (i32, i32) {
    %c0_i32 = arith.constant 0 : i32
    %c0_i32_0 = arith.constant 0 : i32
    %c0_i32_1 = arith.constant 0 : i32
    return %c0_i32, %c0_i32_0 : i32, i32
  }
  func.func @transform_11(%arg0: i32, %arg1: i32) -> (i32, i32) {
    %c0_i32 = arith.constant 0 : i32
    %c0_i32_0 = arith.constant 0 : i32
    %c0_i32_1 = arith.constant 0 : i32
    return %c0_i32, %c0_i32_0 : i32, i32
  }
  func.func @transform_12(%arg0: i32, %arg1: i32) -> (i32, i32) {
    %c0_i32 = arith.constant 0 : i32
    %c0_i32_0 = arith.constant 0 : i32
    %c0_i32_1 = arith.constant 0 : i32
    return %c0_i32, %c0_i32_0 : i32, i32
  }
  func.func @transform_13(%arg0: i32, %arg1: i32) -> (i32, i32) {
    %c0_i32 = arith.constant 0 : i32
    %c0_i32_0 = arith.constant 0 : i32
    %c0_i32_1 = arith.constant 0 : i32
    return %c0_i32, %c0_i32_0 : i32, i32
  }
  func.func @transform_14(%arg0: i32, %arg1: i32) -> (i32, i32) {
    %c0_i32 = arith.constant 0 : i32
    %c0_i32_0 = arith.constant 0 : i32
    %c0_i32_1 = arith.constant 0 : i32
    return %c0_i32, %c0_i32_0 : i32, i32
  }
  func.func @transform_15(%arg0: i32, %arg1: i32) -> (i32, i32) {
    %c0_i32 = arith.constant 0 : i32
    %c0_i32_0 = arith.constant 0 : i32
    %c0_i32_1 = arith.constant 0 : i32
    return %c0_i32, %c0_i32_0 : i32, i32
  }
  func.func @transform_16(%arg0: i32, %arg1: i32) -> (i32, i32) {
    %c0_i32 = arith.constant 0 : i32
    %c0_i32_0 = arith.constant 0 : i32
    %c0_i32_1 = arith.constant 0 : i32
    return %c0_i32, %c0_i32_0 : i32, i32
  }
  func.func @transform_17(%arg0: i32, %arg1: i32) -> (i32, i32) {
    %c0_i32 = arith.constant 0 : i32
    %c0_i32_0 = arith.constant 0 : i32
    %c0_i32_1 = arith.constant 0 : i32
    return %c0_i32, %c0_i32_0 : i32, i32
  }
  func.func @transform_18(%arg0: i32, %arg1: i32) -> (i32, i32) {
    %c0_i32 = arith.constant 0 : i32
    %c0_i32_0 = arith.constant 0 : i32
    %c0_i32_1 = arith.constant 0 : i32
    return %c0_i32, %c0_i32_0 : i32, i32
  }
  func.func @transform_19(%arg0: i32, %arg1: i32) -> (i32, i32) {
    %c0_i32 = arith.constant 0 : i32
    %c0_i32_0 = arith.constant 0 : i32
    %c0_i32_1 = arith.constant 0 : i32
    return %c0_i32, %c0_i32_0 : i32, i32
  }
  func.func @transform_20(%arg0: i32, %arg1: i32) -> (i32, i32, i32) {
    %c0_i32 = arith.constant 0 : i32
    %c0_i32_0 = arith.constant 0 : i32
    return %arg0, %arg1, %c0_i32 : i32, i32, i32
  }
}

</mosaic_0001>

<bundles_post_ra>
// kernel: tpu_custom_call.1
= control target key start
LH: loop header
LB: loop body
LE: loop exit
PB: predicated region body
PF: predicated region fallthrough
CT: control target
= control target key end

     0   :  { %s3570_s21 = smov 0   ;;  %s3574_s6 = smov 0   ;;  %s4137_s0 = inlined_call_operand.vmem [shape: f32[2,16,64], index: 0, kind: input, shape index: {}]   ;;  %s4138_s1 = inlined_call_operand.vmem [shape: bf16[2,16,64], index: 1, kind: input, shape index: {}]   ;;  %s4139_s2 = inlined_call_operand.vmem [shape: bf16[2,16,64], index: 2, kind: input, shape index: {}]   ;;  %s4140_s3 = inlined_call_operand.vmem [shape: bf16[2,8,64], index: 3, kind: input, shape index: {}]   ;;  %s4141_s4 = inlined_call_operand.vmem [shape: bf16[2,8,64], index: 4, kind: input, shape index: {}]   ;;  %s4142_s5 = inlined_call_operand.vmem [shape: bf16[2,64,8], index: 5, kind: input, shape index: {}]   ;;  %s4143_s6 = inlined_call_operand.vmem [shape: f32[1,16], index: 6, kind: input, shape index: {}]   ;;  %s4144_s7 = inlined_call_operand.vmem [shape: bf16[64,64], index: 7, kind: input, shape index: {}]   ;;  %s4145_s8 = inlined_call_operand.vmem [shape: f32[1,64], index: 8, kind: input, shape index: {}]   ;;  %s4146_s9 = inlined_call_operand.vmem [shape: bf16[64,64], index: 9, kind: input, shape index: {}]   ;;  %s4147_s10 = inlined_call_operand.vmem [shape: f32[1,64], index: 10, kind: input, shape index: {}]   ;;  %s4148_s11 = inlined_call_operand.vmem [shape: bf16[64,64], index: 11, kind: input, shape index: {}]   ;;  %s4149_s12 = inlined_call_operand.vmem [shape: f32[1,64], index: 12, kind: input, shape index: {}]   ;;  %s4150_s13 = inlined_call_operand.vmem [shape: bf16[64,64], index: 13, kind: input, shape index: {}]   ;;  %s4151_s14 = inlined_call_operand.vmem [shape: f32[1,64], index: 14, kind: input, shape index: {}]   ;;  %s4152_s15 = inlined_call_operand.vmem [shape: f32[6,64], index: 15, kind: input, shape index: {}]   ;;  %s4153_s16 = inlined_call_operand.vmem [shape: bf16[64,1024], index: 16, kind: input, shape index: {}]   ;;  %s4154_s17 = inlined_call_operand.vmem [shape: f32[1,1024], index: 17, kind: input, shape index: {}]   ;;  %s4155_s18 = inlined_call_operand.vmem [shape: bf16[1024,64], index: 18, kind: input, shape index: {}]   ;;  %s4156_s19 = inlined_call_operand.vmem [shape: f32[1,64], index: 19, kind: input, shape index: {}]   ;;  %s4157_s20 = inlined_call_operand.vmem [shape: f32[2,16,8], index: 20, kind: output, shape index: {}]  }
   0x1   :  { %4158 = sst [smem:[#allocation2_spill]] %s4137_s0 }
   0x2   :  { %4159 = sst [smem:[#allocation3_spill]] %s4138_s1  ;;  %s3572_s1 = smov 0  }
   0x3   :  { %4160 = sst [smem:[#allocation4_spill]] %s4139_s2 }
   0x4   :  { %4161 = sst [smem:[#allocation5_spill]] %s4140_s3 }
   0x5   :  { %4162 = sst [smem:[#allocation6_spill]] %s4141_s4 }
   0x6 LB: > { %s42_s22 = sadd.s32 1, %s3456_s1  ;;  %p2898_p0 = scmp.ge.s32.totalorder %s3460_s6, 1  ;;  %s3460_s6 = sphi %s3574_s6, %s30_s6   ;;  %s3456_s1 = sphi %s3572_s1, %s4169_s1   ;;  %s3452_s21 = sphi %s3570_s21, %s4168_s21  }
   0x7   : > { %p44_p1 = scmp.ge.s32.totalorder %s42_s22, 2  ;;  %p631_p2 = scmp.lt.s32.totalorder %s3460_s6, 3 }
   0x9   : > { %s4171_s22 = smov (%p44_p1, %s42_s22), 0  ;;  %p632_p3 = pnand %p2898_p0, %p631_p2 }
   0xa   : > { %v3292_v0 = vld [vmem:[%s4144_s7] sm:$0xff] (!%p632_p3)   ;;  %v3462_v1 = vmov (!%p632_p3), 0.0   ;;  %v3293_v2 = vld [vmem:[%s4144_s7 + $0x8] sm:$0xff] (!%p632_p3)   ;;  %vm3463_vm0 = vmmov (!%p632_p3), 0   ;;  %p721_p4 = scmp.lt.s32.totalorder (!%p632_p3), %s3452_s21, 1  ;;  %v3294_v3 = vld [vmem:[%s4144_s7 + $0x10] sm:$0xff] (!%p632_p3)  }
   0xb   : > { %635 = sbr.rel (%p632_p3) target bundleno = 3746 (0xea2), region = 100  ;;  %3181 = vmatprep.subr.bf16.mxu0 (!%p632_p3), %v3462_v1  ;;  %3193 = vmatprep.subr.bf16.mxu1 (!%p632_p3), %v3462_v1  ;;  %s4163_s29 = sld [smem:[#allocation2_spill]] (!%p632_p3)  ;;  %v3295_v4 = vld [vmem:[%s4144_s7 + $0x18] sm:$0xff] (!%p632_p3)   ;;  %vm806_vm1 = vcmask (!%p632_p3), 523264   ;;  %v2911_v10 = vld [vmem:[%s4145_s8] ss:$0 sm:$0xff] (!%p632_p3) }
   0xc   : > { %3182 = vmatpush3.bf16.msra.mxu0 (!%p632_p3), %v3292_v0  ;;  %3189 = vmatprep.mubr.msk.bf16.mxu0 (!%p632_p3), %vm3463_vm0, %v3462_v1  ;;  %s4164_s25 = sld [smem:[#allocation3_spill]] (!%p632_p3)  ;;  %vm908_vm2 = vcmask (!%p632_p3), 130048   ;;  %v3298_v38 = vld [vmem:[%s4146_s9] sm:$0xff] (!%p632_p3)   ;;  %v3299_v39 = vld [vmem:[%s4146_s9 + $0x8] sm:$0xff] (!%p632_p3)   ;;  %v3300_v40 = vld [vmem:[%s4146_s9 + $0x10] sm:$0xff] (!%p632_p3)   ;;  %vm1246_vm3 = vcmask (!%p632_p3), 64512  }
   0xd   : > { %3183 = vmatprep.subr.bf16.mxu0 (!%p632_p3), %v3462_v1  ;;  %3195 = vmatprep.mubr.msk.bf16.mxu1 (!%p632_p3), %vm3463_vm0, %v3462_v1  ;;  %v3301_v41 = vld [vmem:[%s4146_s9 + $0x18] sm:$0xff] (!%p632_p3)   ;;  %v2921_v53 = vld [vmem:[%s4147_s10] ss:$0 sm:$0xff] (!%p632_p3)  ;;  %s4167_s0 = sld [smem:[#allocation6_spill]] (!%p632_p3)  ;;  %vm1272_vm4 = vcmask (!%p632_p3), 1043456  }
  0x10   : > { %3184 = vmatpush3.bf16.msra.mxu0 (!%p632_p3), %v3293_v2 }
  0x11   : > { %3185 = vmatprep.subr.bf16.mxu0 (!%p632_p3), %v3462_v1 }
  0x12   : > { %s4173_s21 = smov (!%p721_p4, %s3452_s21), 1 }
  0x13   : > { %s3055_s27 = sshll.u32 %s4173_s21, 4  ;;  %s3056_s2 = sshll.u32 %s4173_s21, 3 }
  0x14   : > { %s728_s30 = scalar_lea.vmem %s4163_s29, %s3055_s27  ;;  %3186 = vmatpush3.bf16.msra.mxu0 %v3294_v3  ;;  %s734_s26 = scalar_lea.vmem %s4164_s25, %s3056_s2 }
  0x15   : > { %v3616_v5 = vld [vmem:[%s728_s30] sm:$0xff]  ;;  %v3618_v6 = vld [vmem:[%s728_s30 + $0x8] sm:$0xff]  ;;  %3187 = vmatprep.subr.bf16.mxu0 %v3462_v1  ;;  %s4165_s29 = sld [smem:[#allocation4_spill]]  ;;  %s4166_s25 = sld [smem:[#allocation5_spill]] }
  0x16   : > { %v774_v7 = vpack.c.bf16 %v3618_v6, %v3616_v5  ;;  %v3296_v8 = vld [vmem:[%s734_s26] sm:$0xff]   ;;  %s3058_s24 = sshll.u32 %s4173_s21, 5 }
  0x17   : > { %v865_v9 = vsel %vm806_vm1, %v3296_v8, 0 }
  0x18   : > { %3188 = vmatpush3.bf16.msra.mxu0 %v3295_v4  ;;  %3194 = vmatpush3.bf16.xpose.msra.mxu1 %v865_v9 }
  0x19   : > { %3205 = vmatprep.subr.bf16.mxu0 %v3462_v1  ;;  %3199 = vmatprep.subr.bf16.mxu1 %v3462_v1 }
  0x1b   : > { %3190 = vmatmul.mubr.msk.bf16.vlgmr.msra.gmra.mrb[0].mxu0 %vm806_vm1, %v774_v7  ;;  %s739_s30 = scalar_lea.vmem %s4165_s29, %s3056_s2  ;;  %s2905_s2 = sshll.u32 %s4173_s21, 2 }
  0x1c   : > { %3213 = vmatprep.mubr.msk.bf16.mxu0 %vm3463_vm0, %v3462_v1  ;;  %v3297_v26 = vld [vmem:[%s739_s30] sm:$0xff]   ;;  %3206 = vmatpush3.bf16.msra.mxu0 %v3298_v38  ;;  %s743_s26 = scalar_lea.vmem %s4166_s25, %s2905_s2  ;;  %s747_s23 = scalar_lea.vmem %s4167_s0, %s2905_s2 }
  0x1d   : > { %3207 = vmatprep.subr.bf16.mxu0 %v3462_v1  ;;  %s761_s2 = scalar_lea.vmem %s4157_s20, %s3055_s27 }
  0x20   : > { %3208 = vmatpush3.bf16.msra.mxu0 %v3299_v39 }
  0x21   : > { %3209 = vmatprep.subr.bf16.mxu0 %v3462_v1 }
  0x24   : > { %3210 = vmatpush3.bf16.msra.mxu0 %v3300_v40 }
  0x25   : > { %3211 = vmatprep.subr.bf16.mxu0 %v3462_v1 }
  0x28   : > { %3212 = vmatpush3.bf16.msra.mxu0 %v3301_v41 }
  0x29   : > { %3229 = vmatprep.subr.bf16.mxu0 %v3462_v1 }
  0xee   : > { %v844_v11 = vpop.f32.mrb[0].mxu0 }
  0xef   : > { %v845_v12 = vadd.f32 %v2911_v10, %v844_v11  ;;  %v3191_v13 = vpop.f32.mrb[1].mxu0 }
  0xf0   : > { %v847_v14 = vpop.f32.mrb[2].mxu0  ;;  %v3304_v13 = vld [vmem:[%s4148_s11 + $0x10] sm:$0xff]  }
  0xf1   : > { %v848_v15 = vadd.f32 %v2911_v10, %v847_v14  ;;  %v3192_v16 = vpop.f32.mrb[3].mxu0  ;;  %v851_v17 = vmul.f32 0.125, %v845_v12  ;;  %v3303_v12 = vld [vmem:[%s4148_s11 + $0x8] sm:$0xff]   ;;  %v3305_v14 = vld [vmem:[%s4148_s11 + $0x18] sm:$0xff]  }
  0xf3   : > { %v852_v18 = vmul.f32 0.125, %v848_v15 }
  0xf5   : > { %v855_v19 = vpack.c.bf16 %v852_v18, %v851_v17 }
  0xf7   : > { %3196 = vmatmul.mubr.msk.bf16.vlgmr.msra.gmra.mrb[0].mxu1 %vm806_vm1, %v855_v19 }
  0xf8   : > { %3201 = vmatprep.mubr.msk.bf16.mxu1 %vm3463_vm0, %v3462_v1  ;;  %3200 = vmatpush3.bf16.msra.mxu1 %v3297_v26 }
  0xf9   : > { %3217 = vmatprep.subr.bf16.mxu1 %v3462_v1 }
 0x1ca   : > { %v901_v20 = vpop.f32.mrb[0].mxu1 }
 0x1cb   : > { %v3197_v21 = vpop.f32.mrb[1].mxu1  ;;  %v909_v22 = vsel %vm908_vm2, %v901_v20, -inf }
 0x1cc   : > { %910 = vmax.xlane.f32.xlu0 %v909_v22  ;;  %v904_v23 = vpop.f32.mrb[2].mxu1  ;;  %v2927_v22 = vld [vmem:[%s4152_s15] ss:$0 sm:$0xff] }
 0x1cd   : > { %v3198_v24 = vpop.f32.mrb[3].mxu1  ;;  %v912_v25 = vsel %vm908_vm2, %v904_v23, -inf }
 0x1d0   : > { %913 = vmax.xlane.f32.xlu0 %v912_v25 }
 0x259   : > { %v911_v27 = vpop.xlane.xlu0 %910 }
 0x25a   : > { %v915_v28 = vsub.f32 %v901_v20, %v911_v27  ;;  %v2928_v27 = vld [vmem:[%s4152_s15 + $0x1] ss:$0 sm:$0xff] }
 0x25c   : > { %v917_v29 = vmul.f32 1.442695, %v915_v28 }
 0x25d   : > { %v914_v30 = vpop.xlane.xlu0 %913 }
 0x25e   : > { %3378 = vpow2.f32 %v917_v29  ;;  %v916_v31 = vsub.f32 %v904_v23, %v914_v30 }
 0x260   : > { %v919_v32 = vmul.f32 1.442695, %v916_v31 }
 0x262   : > { %3380 = vpow2.f32 %v919_v32  ;;  %v1197_v32 = vld [vmem:[%s743_s26] sm:$0xf]  ;;  %s752_s26 = scalar_lea.vmem %s4142_s5, %s3058_s24 }
 0x268   : > { %v3379_v33 = vpop.eup %3378 }
 0x269   : > { %v921_v34 = vsel %vm908_vm2, %v3379_v33, 0.0 }
 0x26a   : > { %922 = vadd.xlane.f32.xlu1 %v921_v34  ;;  %v2929_v34 = vld [vmem:[%s4149_s12] ss:$0 sm:$0xff] }
 0x26c   : > { %v3381_v35 = vpop.eup %3380 }
 0x26d   : > { %v924_v36 = vsel %vm908_vm2, %v3381_v35, 0.0  ;;  %v931_v37 = vpack.c.bf16 %v3381_v35, %v3379_v33  ;;  %v1203_v33 = vsel %vm806_vm1, %v1197_v32, 0 }
 0x26e   : > { %925 = vadd.xlane.f32.xlu1 %v924_v36 }
 0x26f   : > { %3202 = vmatmul.mubr.msk.bf16.vlgmr.msra.gmra.mrb[4].mxu1 %vm908_vm2, %v931_v37 }
 0x270   : > { %3225 = vmatprep.mubr.msk.bf16.mxu1 %vm3463_vm0, %v3462_v1 }
 0x2f7   : > { %v923_v42 = vpop.xlane.xlu1 %922 }
 0x2f8   : > { %3382 = vrcp.f32 %v923_v42 }
 0x2fb   : > { %v926_v43 = vpop.xlane.xlu1 %925 }
 0x2fc   : > { %3384 = vrcp.f32 %v926_v43 }
 0x302   : > { %v3383_v45 = vpop.eup %3382 }
 0x306   : > { %v3385_v47 = vpop.eup %3384 }
 0x342   : > { %v975_v44 = vpop.f32.mrb[4].mxu1 }
 0x343   : > { %v3203_v46 = vpop.f32.mrb[5].mxu1  ;;  %v982_v49 = vmul.f32 %v3383_v45, %v975_v44 }
 0x344   : > { %v978_v48 = vpop.f32.mrb[6].mxu1 }
 0x345   : > { %v983_v50 = vmul.f32 %v3385_v47, %v978_v48  ;;  %v3204_v51 = vpop.f32.mrb[7].mxu1 }
 0x347   : > { %v992_v52 = vpack.c.bf16 %v983_v50, %v982_v49  ;;  %v1267_v50 = vld [vmem:[%s747_s23] sm:$0xf] }
 0x348   : > { %v1274_v51 = vsel %vm1272_vm4, %v1267_v50, 0 }
 0x349   : > { %3214 = vmatmul.mubr.msk.bf16.vlgmr.msra.gmra.mrb[4].mxu0 %vm806_vm1, %v992_v52 }
 0x34a   : > { %3231 = vmatprep.mubr.msk.bf16.mxu0 %vm3463_vm0, %v3462_v1  ;;  %3230 = vmatpush3.bf16.xpose.msra.mxu0 %v1203_v33 }
 0x34b   : > { %3241 = vmatprep.subr.bf16.mxu0 %v3462_v1 }
 0x41c   : > { %v1061_v54 = vpop.f32.mrb[4].mxu0 }
 0x41d   : > { %v1062_v55 = vadd.f32 %v2921_v53, %v1061_v54  ;;  %v3215_v56 = vpop.f32.mrb[5].mxu0 }
 0x41e   : > { %v1064_v57 = vpop.f32.mrb[6].mxu0 }
 0x41f   : > { %v1065_v58 = vadd.f32 %v2921_v53, %v1064_v57  ;;  %v3216_v59 = vpop.f32.mrb[7].mxu0  ;;  %v1068_v60 = vadd.f32 %v1062_v55, %v3616_v5 }
 0x421   : > { %v1072_v61 = vsel %vm806_vm1, %v1068_v60, 0.0  ;;  %v1069_v62 = vadd.f32 %v1065_v58, %v3618_v6  ;;  %v3302_v6 = vld [vmem:[%s4148_s11] sm:$0xff]  }
 0x422   : > { %1073 = vadd.xlane.f32.xlu0 %v1072_v61  ;;  %3218 = vmatpush3.bf16.msra.mxu1 %v3302_v6 }
 0x423   : > { %v1075_v63 = vsel %vm806_vm1, %v1069_v62, 0.0  ;;  %3219 = vmatprep.subr.bf16.mxu1 %v3462_v1 }
 0x424   : > { %1076 = vadd.xlane.f32.xlu1 %v1075_v63  ;;  %v3306_v63 = vld [vmem:[%s4150_s13] sm:$0xff]  }
 0x426   : > { %3220 = vmatpush3.bf16.msra.mxu1 %v3303_v12 }
 0x427   : > { %3221 = vmatprep.subr.bf16.mxu1 %v3462_v1 }
 0x42a   : > { %3222 = vmatpush3.bf16.msra.mxu1 %v3304_v13 }
 0x42b   : > { %3223 = vmatprep.subr.bf16.mxu1 %v3462_v1 }
 0x42e   : > { %3224 = vmatpush3.bf16.msra.mxu1 %v3305_v14 }
 0x42f   : > { %3235 = vmatprep.subr.bf16.mxu1 %v3462_v1 }
 0x4af   : > { %v1074_v0 = vpop.xlane.xlu0 %1073 }
 0x4b0   : > { %v1079_v2 = vmul.f32 0.015625, %v1074_v0  ;;  %v3307_v0 = vld [vmem:[%s4150_s13 + $0x8] sm:$0xff]  }
 0x4b1   : > { %v1077_v3 = vpop.xlane.xlu1 %1076 }
 0x4b2   : > { %v1081_v4 = vsub.f32 %v1068_v60, %v1079_v2  ;;  %v1080_v7 = vmul.f32 0.015625, %v1077_v3  ;;  %v3308_v2 = vld [vmem:[%s4150_s13 + $0x10] sm:$0xff]   ;;  %v3309_v3 = vld [vmem:[%s4150_s13 + $0x18] sm:$0xff]  }
 0x4b4   : > { %v1082_v8 = vsub.f32 %v1069_v62, %v1080_v7  ;;  %v1083_v9 = vmul.f32 %v1081_v4, %v1081_v4 }
 0x4b6   : > { %v1085_v10 = vsel %vm806_vm1, %v1083_v9, 0.0  ;;  %v1084_v11 = vmul.f32 %v1082_v8, %v1082_v8 }
 0x4b7   : > { %1086 = vadd.xlane.f32.xlu0 %v1085_v10 }
 0x4b8   : > { %v1088_v5 = vsel %vm806_vm1, %v1084_v11, 0.0 }
 0x4b9   : > { %1089 = vadd.xlane.f32.xlu1 %v1088_v5 }
 0x544   : > { %v1087_v15 = vpop.xlane.xlu0 %1086 }
 0x545   : > { %v1091_v16 = vmul.f32 0.015625, %v1087_v15  ;;  %v2937_v15 = vld [vmem:[%s4151_s14] ss:$0 sm:$0xff] }
 0x546   : > { %v1090_v17 = vpop.xlane.xlu1 %1089 }
 0x547   : > { %v1093_v18 = vadd.f32 1e-05, %v1091_v16  ;;  %v1092_v19 = vmul.f32 0.015625, %v1090_v17 }
 0x549   : > { %3386 = vrsqrt.f32 %v1093_v18  ;;  %v1094_v20 = vadd.f32 1e-05, %v1092_v19 }
 0x54b   : > { %3388 = vrsqrt.f32 %v1094_v20 }
 0x553   : > { %v3387_v21 = vpop.eup %3386 }
 0x554   : > { %v1097_v23 = vmul.f32 %v3387_v21, %v1081_v4 }
 0x555   : > { %v3389_v24 = vpop.eup %3388 }
 0x556   : > { %v1103_v25 = vmul.f32 %v2927_v22, %v1097_v23  ;;  %v1098_v26 = vmul.f32 %v3389_v24, %v1082_v8 }
 0x558   : > { %v1104_v28 = vmul.f32 %v2927_v22, %v1098_v26  ;;  %v3700_v29 = vadd.f32 %v2928_v27, %v1103_v25 }
 0x55a   : > { %v3702_v30 = vadd.f32 %v2928_v27, %v1104_v28 }
 0x55c   : > { %v1119_v31 = vpack.c.bf16 %v3702_v30, %v3700_v29 }
 0x55e   : > { %3226 = vmatmul.mubr.msk.bf16.vlgmr.msra.gmra.mrb[8].mxu1 %vm806_vm1, %v1119_v31 }
 0x55f   : > { %3237 = vmatprep.mubr.msk.bf16.mxu1 %vm3463_vm0, %v3462_v1  ;;  %3236 = vmatpush3.bf16.msra.mxu1 %v1274_v51 }
 0x631   : > { %v1188_v35 = vpop.f32.mrb[8].mxu1 }
 0x632   : > { %v1189_v36 = vadd.f32 %v2929_v34, %v1188_v35  ;;  %v3227_v37 = vpop.f32.mrb[9].mxu1 }
 0x633   : > { %v1191_v38 = vpop.f32.mrb[10].mxu1  ;;  %v1449_v37 = vld [vmem:[%s4153_s16 + $0x20] sm:$0xff] }
 0x634   : > { %v1192_v39 = vadd.f32 %v2929_v34, %v1191_v38  ;;  %v3228_v40 = vpop.f32.mrb[11].mxu1  ;;  %v1195_v41 = vmul.f32 0.125, %v1189_v36  ;;  %v1445_v36 = vld [vmem:[%s4153_s16] sm:$0xff]  ;;  %v1446_v38 = vld [vmem:[%s4153_s16 + $0x8] sm:$0xff] }
 0x635   : > { %v1450_v40 = vld [vmem:[%s4153_s16 + $0x28] sm:$0xff] }
 0x636   : > { %v1196_v42 = vmul.f32 0.125, %v1192_v39  ;;  %v2946_v39 = vcombine.high %v1445_v36, %v1449_v37 }
 0x638   : > { %v1198_v43 = vpack.c.bf16 %v1196_v42, %v1195_v41  ;;  %v2945_v41 = vcombine.low %v1445_v36, %v1449_v37  ;;  %v2947_v42 = vcombine.low %v1446_v38, %v1450_v40  ;;  %1683 = vmatprep.subr.bf16.mxu1 %v2946_v39  ;;  %v1463_v37 = vld [vmem:[%s4153_s16 + $0x90] sm:$0xff]  ;;  %v1464_v39 = vld [vmem:[%s4153_s16 + $0x98] sm:$0xff] }
 0x63a   : > { %3232 = vmatmul.mubr.msk.bf16.vlgmr.msra.gmra.mrb[8].mxu0 %vm806_vm1, %v1198_v43  ;;  %v2948_v43 = vcombine.high %v1446_v38, %v1450_v40  ;;  %v1467_v38 = vld [vmem:[%s4153_s16 + $0xb0] sm:$0xff]  ;;  %v1468_v40 = vld [vmem:[%s4153_s16 + $0xb8] sm:$0xff] }
 0x63b   : > { %3249 = vmatprep.mubr.msk.bf16.mxu0 %vm3463_vm0, %v3462_v1  ;;  %3242 = vmatpush3.bf16.msra.mxu0 %v3306_v63 }
 0x63c   : > { %3243 = vmatprep.subr.bf16.mxu0 %v3462_v1 }
 0x63f   : > { %3244 = vmatpush3.bf16.msra.mxu0 %v3307_v0  ;;  %v1474_v0 = vld [vmem:[%s4153_s16 + $0xe8] sm:$0xff] }
 0x640   : > { %3245 = vmatprep.subr.bf16.mxu0 %v3462_v1 }
 0x643   : > { %3246 = vmatpush3.bf16.msra.mxu0 %v3308_v2 }
 0x644   : > { %3247 = vmatprep.subr.bf16.mxu0 %v3462_v1 }
 0x647   : > { %3248 = vmatpush3.bf16.msra.mxu0 %v3309_v3 }
 0x648   : > { %1726 = vmatprep.subr.bf16.mxu0 %v2948_v43  ;;  %v2966_v43 = vcombine.high %v1463_v37, %v1467_v38 }
 0x70d   : > { %v1239_v44 = vpop.f32.mrb[8].mxu0 }
 0x70e   : > { %v3233_v45 = vpop.f32.mrb[9].mxu0  ;;  %v1247_v46 = vsel %vm1246_vm3, %v1239_v44, -inf }
 0x70f   : > { %1248 = vmax.xlane.f32.xlu0 %v1247_v46  ;;  %v1242_v47 = vpop.f32.mrb[10].mxu0  ;;  %v1457_v45 = vld [vmem:[%s4153_s16 + $0x60] sm:$0xff]  ;;  %v1454_v46 = vld [vmem:[%s4153_s16 + $0x48] sm:$0xff] }
 0x710   : > { %v3234_v48 = vpop.f32.mrb[11].mxu0  ;;  %v1250_v49 = vsel %vm1246_vm3, %v1242_v47, -inf }
 0x711   : > { %1251 = vmax.xlane.f32.xlu1 %v1250_v49  ;;  %v1458_v48 = vld [vmem:[%s4153_s16 + $0x68] sm:$0xff] }
 0x712   : > { %v2955_v50 = vcombine.low %v1454_v46, %v1458_v48  ;;  %v2956_v51 = vcombine.high %v1454_v46, %v1458_v48  ;;  %v1475_v46 = vld [vmem:[%s4153_s16 + $0xf0] sm:$0xff]  ;;  %v1476_v48 = vld [vmem:[%s4153_s16 + $0xf8] sm:$0xff] }
 0x79c   : > { %v1249_v52 = vpop.xlane.xlu0 %1248 }
 0x79d   : > { %v1253_v53 = vsub.f32 %v1239_v44, %v1249_v52  ;;  %v1453_v44 = vld [vmem:[%s4153_s16 + $0x40] sm:$0xff] }
 0x79e   : > { %v1252_v54 = vpop.xlane.xlu1 %1251  ;;  %v2953_v49 = vcombine.low %v1453_v44, %v1457_v45  ;;  %v1461_v52 = vld [vmem:[%s4153_s16 + $0x80] sm:$0xff] }
 0x79f   : > { %v1255_v55 = vmul.f32 1.442695, %v1253_v53  ;;  %v1254_v56 = vsub.f32 %v1242_v47, %v1252_v54  ;;  %v2954_v47 = vcombine.high %v1453_v44, %v1457_v45  ;;  %v1465_v53 = vld [vmem:[%s4153_s16 + $0xa0] sm:$0xff]  ;;  %v1462_v54 = vld [vmem:[%s4153_s16 + $0x88] sm:$0xff]  ;;  %v2968_v44 = vcombine.high %v1464_v39, %v1468_v40  ;;  %v1471_v45 = vld [vmem:[%s4153_s16 + $0xd0] sm:$0xff] }
 0x7a1   : > { %3390 = vpow2.f32 %v1255_v55  ;;  %v1257_v57 = vmul.f32 1.442695, %v1254_v56  ;;  %v2962_v55 = vcombine.high %v1461_v52, %v1465_v53  ;;  %v1466_v56 = vld [vmem:[%s4153_s16 + $0xa8] sm:$0xff] }
 0x7a3   : > { %3392 = vpow2.f32 %v1257_v57  ;;  %v2961_v57 = vcombine.low %v1461_v52, %v1465_v53  ;;  %v2973_v53 = vcombine.low %v1471_v45, %v1475_v46 }
 0x7ab   : > { %v3391_v58 = vpop.eup %3390 }
 0x7ac   : > { %v1259_v59 = vsel %vm1246_vm3, %v3391_v58, 0.0 }
 0x7ad   : > { %v3393_v60 = vpop.eup %3392  ;;  %1260 = vadd.xlane.f32.xlu0 %v1259_v59  ;;  %v2964_v59 = vcombine.high %v1462_v54, %v1466_v56 }
 0x7ae   : > { %v1262_v61 = vsel %vm1246_vm3, %v3393_v60, 0.0  ;;  %v1268_v62 = vpack.c.bf16 %v3393_v60, %v3391_v58  ;;  %v2963_v58 = vcombine.low %v1462_v54, %v1466_v56  ;;  %v1469_v60 = vld [vmem:[%s4153_s16 + $0xc0] sm:$0xff] }
 0x7af   : > { %1263 = vadd.xlane.f32.xlu1 %v1262_v61  ;;  %v1473_v61 = vld [vmem:[%s4153_s16 + $0xe0] sm:$0xff] }
 0x7b0   : > { %3238 = vmatmul.mubr.msk.bf16.vlgmr.msra.gmra.mrb[12].mxu1 %vm1246_vm3, %v1268_v62  ;;  %v1470_v62 = vld [vmem:[%s4153_s16 + $0xc8] sm:$0xff]  ;;  %v2970_v63 = vcombine.high %v1469_v60, %v1473_v61  ;;  %v2969_v2 = vcombine.low %v1469_v60, %v1473_v61  ;;  %v3311_v56 = vld [vmem:[%s4155_s18 + $0xc0] sm:$0xff]  }
 0x7b1   : > { %1684 = vmatpush1.bf16.msra.mxu1 %v2945_v41  ;;  %v2971_v3 = vcombine.low %v1470_v62, %v1474_v0  ;;  %v3315_v60 = vld [vmem:[%s4155_s18 + $0xc8] sm:$0xff]  }
 0x7b2   : > { %1685 = vmatprep.subr.bf16.mxu1 %v2954_v47  ;;  %v1472_v47 = vld [vmem:[%s4153_s16 + $0xd8] sm:$0xff]  ;;  %v3316_v61 = vld [vmem:[%s4155_s18 + $0x8] sm:$0xff]  }
 0x7b3   : > { %v2976_v52 = vcombine.high %v1472_v47, %v1476_v48  ;;  %v2975_v54 = vcombine.low %v1472_v47, %v1476_v48 }
 0x7b5   : > { %1686 = vmatpush1.bf16.msra.mxu1 %v2953_v49  ;;  %v2965_v49 = vcombine.low %v1463_v37, %v1467_v38 }
 0x7b6   : > { %1687 = vmatprep.subr.bf16.mxu1 %v2962_v55  ;;  %v3310_v55 = vld [vmem:[%s4155_s18 + $0x40] sm:$0xff]  }
 0x7b9   : > { %1688 = vmatpush1.bf16.msra.mxu1 %v2961_v57  ;;  %v3312_v57 = vld [vmem:[%s4155_s18] sm:$0xff]  }
 0x7ba   : > { %1689 = vmatprep.subr.bf16.mxu1 %v2970_v63  ;;  %v3318_v63 = vld [vmem:[%s4155_s18 + $0x50] sm:$0xff]  }
 0x7bd   : > { %1690 = vmatpush1.bf16.msra.mxu1 %v2969_v2  ;;  %v3320_v2 = vld [vmem:[%s4155_s18 + $0x10] sm:$0xff]  }
 0x83a   : > { %v1261_v4 = vpop.xlane.xlu0 %1260 }
 0x83b   : > { %3394 = vrcp.f32 %v1261_v4  ;;  %v2972_v4 = vcombine.high %v1470_v62, %v1474_v0  ;;  %v3317_v62 = vld [vmem:[%s4155_s18 + $0x88] sm:$0xff]   ;;  %v3319_v0 = vld [vmem:[%s4155_s18 + $0xd0] sm:$0xff]  }
 0x83c   : > { %v1264_v7 = vpop.xlane.xlu1 %1263 }
 0x83d   : > { %3396 = vrcp.f32 %v1264_v7  ;;  %v1447_v7 = vld [vmem:[%s4153_s16 + $0x10] sm:$0xff] }
 0x845   : > { %v3395_v9 = vpop.eup %3394 }
 0x847   : > { %v3397_v11 = vpop.eup %3396 }
 0x883   : > { %v1310_v8 = vpop.f32.mrb[12].mxu1 }
 0x884   : > { %v3239_v10 = vpop.f32.mrb[13].mxu1  ;;  %v1317_v6 = vmul.f32 %v3395_v9, %v1310_v8  ;;  %v1451_v8 = vld [vmem:[%s4153_s16 + $0x30] sm:$0xff]  ;;  %v1448_v9 = vld [vmem:[%s4153_s16 + $0x18] sm:$0xff] }
 0x885   : > { %v1313_v5 = vpop.f32.mrb[14].mxu1  ;;  %v3464_v10 = vmov 0  }
 0x886   : > { %v1318_v12 = vmul.f32 %v3397_v11, %v1313_v5  ;;  %v3240_v13 = vpop.f32.mrb[15].mxu1  ;;  %1715 = vmatprep.mubr.bf16.mxu1 %v3464_v10  ;;  %v2949_v11 = vcombine.low %v1447_v7, %v1451_v8  ;;  %v2950_v5 = vcombine.high %v1447_v7, %v1451_v8  ;;  %v3323_v7 = vld [vmem:[%s4155_s18 + $0xd8] sm:$0xff]  }
 0x887   : > { %v3324_v8 = vld [vmem:[%s4155_s18 + $0x18] sm:$0xff]  }
 0x888   : > { %v1327_v14 = vpack.c.bf16 %v1318_v12, %v1317_v6  ;;  %v1452_v6 = vld [vmem:[%s4153_s16 + $0x38] sm:$0xff]  ;;  %1769 = vmatprep.subr.bf16.mxu1 %v2950_v5  ;;  %v3328_v5 = vld [vmem:[%s4155_s18 + $0x20] sm:$0xff]  }
 0x889   : > { %v2951_v12 = vcombine.low %v1448_v9, %v1452_v6  ;;  %v2952_v13 = vcombine.high %v1448_v9, %v1452_v6  ;;  %v3325_v9 = vld [vmem:[%s4155_s18 + $0x98] sm:$0xff]   ;;  %v3329_v6 = vld [vmem:[%s4155_s18 + $0xa0] sm:$0xff]  }
 0x88a   : > { %3250 = vmatmul.mubr.msk.bf16.vlgmr.msra.gmra.mrb[12].mxu0 %vm806_vm1, %v1327_v14 }
 0x88b   : > { %1727 = vmatpush1.bf16.msra.mxu0 %v2947_v42  ;;  %1758 = vmatprep.mubr.bf16.mxu0 %v3464_v10 }
 0x88c   : > { %1728 = vmatprep.subr.bf16.mxu0 %v2956_v51  ;;  %v2974_v51 = vcombine.high %v1471_v45, %v1475_v46 }
 0x88f   : > { %1729 = vmatpush1.bf16.msra.mxu0 %v2955_v50  ;;  %v2967_v50 = vcombine.low %v1464_v39, %v1468_v40 }
 0x890   : > { %1730 = vmatprep.subr.bf16.mxu0 %v2964_v59  ;;  %v3314_v59 = vld [vmem:[%s4155_s18 + $0x48] sm:$0xff]  }
 0x893   : > { %1731 = vmatpush1.bf16.msra.mxu0 %v2963_v58  ;;  %v3313_v58 = vld [vmem:[%s4155_s18 + $0x80] sm:$0xff]  }
 0x894   : > { %1732 = vmatprep.subr.bf16.mxu0 %v2972_v4  ;;  %v3322_v4 = vld [vmem:[%s4155_s18 + $0x58] sm:$0xff]  }
 0x897   : > { %1733 = vmatpush1.bf16.msra.mxu0 %v2971_v3  ;;  %v3321_v3 = vld [vmem:[%s4155_s18 + $0x90] sm:$0xff]  }
 0x898   : > { %1812 = vmatprep.subr.bf16.mxu0 %v2952_v13  ;;  %v3331_v13 = vld [vmem:[%s4155_s18 + $0xe8] sm:$0xff]  }
 0x95d   : > { %v1396_v16 = vpop.f32.mrb[12].mxu0 }
 0x95e   : > { %v1397_v17 = vadd.f32 %v2937_v15, %v1396_v16  ;;  %v3251_v18 = vpop.f32.mrb[13].mxu0 }
 0x95f   : > { %v1399_v19 = vpop.f32.mrb[14].mxu0 }
 0x960   : > { %v1400_v20 = vadd.f32 %v2937_v15, %v1399_v19  ;;  %v3252_v21 = vpop.f32.mrb[15].mxu0  ;;  %v1403_v22 = vadd.f32 %v1397_v17, %v3700_v29 }
 0x961   : > { %v2943_v21 = vld [vmem:[%s4152_s15 + $0x2] ss:$0 sm:$0xff] }
 0x962   : > { %v1407_v23 = vsel %vm806_vm1, %v1403_v22, 0.0  ;;  %v1404_v24 = vadd.f32 %v1400_v20, %v3702_v30 }
 0x963   : > { %1408 = vadd.xlane.f32.xlu0 %v1407_v23 }
 0x964   : > { %v1410_v25 = vsel %vm806_vm1, %v1404_v24, 0.0 }
 0x965   : > { %1411 = vadd.xlane.f32.xlu1 %v1410_v25 }
 0x9f0   : > { %v1409_v26 = vpop.xlane.xlu0 %1408 }
 0x9f1   : > { %v1413_v27 = vmul.f32 0.015625, %v1409_v26  ;;  %v2944_v26 = vld [vmem:[%s4152_s15 + $0x3] ss:$0 sm:$0xff] }
 0x9f2   : > { %v1412_v28 = vpop.xlane.xlu1 %1411 }
 0x9f3   : > { %v3752_v31 = vsub.f32 %v1403_v22, %v1413_v27  ;;  %v1414_v32 = vmul.f32 0.015625, %v1412_v28  ;;  %v1455_v28 = vld [vmem:[%s4153_s16 + $0x50] sm:$0xff] }
 0x9f5   : > { %v3754_v33 = vsub.f32 %v1404_v24, %v1414_v32  ;;  %v1417_v34 = vmul.f32 %v3752_v31, %v3752_v31  ;;  %v1459_v32 = vld [vmem:[%s4153_s16 + $0x70] sm:$0xff] }
 0x9f6   : > { %v2957_v41 = vcombine.low %v1455_v28, %v1459_v32 }
 0x9f7   : > { %v1419_v29 = vsel %vm806_vm1, %v1417_v34, 0.0  ;;  %v1418_v30 = vmul.f32 %v3754_v33, %v3754_v33 }
 0x9f8   : > { %1420 = vadd.xlane.f32.xlu0 %v1419_v29 }
 0x9f9   : > { %v1422_v35 = vsel %vm806_vm1, %v1418_v30, 0.0 }
 0x9fa   : > { %1423 = vadd.xlane.f32.xlu1 %v1422_v35  ;;  %v2958_v35 = vcombine.high %v1455_v28, %v1459_v32 }
 0xa85   : > { %v1421_v14 = vpop.xlane.xlu0 %1420 }
 0xa86   : > { %v1425_v15 = vmul.f32 0.015625, %v1421_v14  ;;  %v3332_v14 = vld [vmem:[%s4155_s18 + $0x28] sm:$0xff]  }
 0xa87   : > { %v1424_v16 = vpop.xlane.xlu1 %1423 }
 0xa88   : > { %v1427_v17 = vadd.f32 1e-05, %v1425_v15  ;;  %v1426_v18 = vmul.f32 0.015625, %v1424_v16  ;;  %v3333_v15 = vld [vmem:[%s4155_s18 + $0xa8] sm:$0xff]   ;;  %v3334_v16 = vld [vmem:[%s4155_s18 + $0x70] sm:$0xff]  }
 0xa8a   : > { %3398 = vrsqrt.f32 %v1427_v17  ;;  %v1428_v19 = vadd.f32 1e-05, %v1426_v18  ;;  %v3335_v17 = vld [vmem:[%s4155_s18 + $0xf0] sm:$0xff]  }
 0xa8b   : > { %v3336_v18 = vld [vmem:[%s4155_s18 + $0x30] sm:$0xff]  }
 0xa8c   : > { %3400 = vrsqrt.f32 %v1428_v19  ;;  %v3337_v19 = vld [vmem:[%s4155_s18 + $0xb0] sm:$0xff]  }
 0xa94   : > { %v3399_v20 = vpop.eup %3398 }
 0xa95   : > { %v1431_v22 = vmul.f32 %v3399_v20, %v3752_v31  ;;  %v1456_v31 = vld [vmem:[%s4153_s16 + $0x58] sm:$0xff] }
 0xa96   : > { %v3401_v23 = vpop.eup %3400  ;;  %v3338_v20 = vld [vmem:[%s4155_s18 + $0x78] sm:$0xff]  }
 0xa97   : > { %v1437_v24 = vmul.f32 %v2943_v21, %v1431_v22  ;;  %v1432_v25 = vmul.f32 %v3401_v23, %v3754_v33  ;;  %v1460_v33 = vld [vmem:[%s4153_s16 + $0x78] sm:$0xff] }
 0xa98   : > { %v2960_v36 = vcombine.high %v1456_v31, %v1460_v33  ;;  %v2959_v42 = vcombine.low %v1456_v31, %v1460_v33  ;;  %v3340_v22 = vld [vmem:[%s4155_s18 + $0x38] sm:$0xff]   ;;  %v1478_v31 = vld [vmem:[%s4154_s17] sm:$0xff] }
 0xa99   : > { %v1438_v27 = vmul.f32 %v2943_v21, %v1432_v25  ;;  %v3842_v34 = vadd.f32 %v2944_v26, %v1437_v24  ;;  %v3339_v21 = vld [vmem:[%s4155_s18 + $0xf8] sm:$0xff]   ;;  %v3342_v24 = vld [vmem:[%s4155_s18 + $0x140] sm:$0xff]  }
 0xa9a   : > { %v3341_v23 = vld [vmem:[%s4155_s18 + $0xb8] sm:$0xff]   ;;  %v3343_v25 = vld [vmem:[%s4155_s18 + $0x1c0] sm:$0xff]  }
 0xa9b   : > { %v3844_v29 = vadd.f32 %v2944_v26, %v1438_v27  ;;  %v1480_v26 = vlaneseq }
 0xa9d   : > { %v1477_v30 = vpack.c.bf16 %v3844_v29, %v3842_v34  ;;  %v1481_v27 = vshrl.u32 %v1480_v26, 7 }
 0xa9f   : > { %2977 = vmatmul.mubr.msk.bf16.vlgmr.msra.gmra.mrb[16].mxu1 %vm806_vm1, %v1477_v30  ;;  %2978 = vmatmul.mubr.msk.bf16.vlgmr.msra.gmra.mrb[16].mxu0 %vm806_vm1, %v1477_v30  ;;  %v1482_v28 = vsub.s32 0, %v1481_v27  ;;  %v1490_v32 = vsub.s32 2, %v1481_v27  ;;  %v1486_v33 = vsub.s32 1, %v1481_v27 }
 0xaa0   : > { %1770 = vmatpush1.bf16.msra.mxu1 %v2949_v11  ;;  %1813 = vmatpush1.bf16.msra.mxu0 %v2951_v12  ;;  %v3327_v11 = vld [vmem:[%s4155_s18 + $0xe0] sm:$0xff]   ;;  %v3330_v12 = vld [vmem:[%s4155_s18 + $0x68] sm:$0xff]  }
 0xaa1   : > { %1771 = vmatprep.subr.bf16.mxu1 %v2958_v35  ;;  %1814 = vmatprep.subr.bf16.mxu0 %v2960_v36  ;;  %v1483_v35 = vrot.slane %v1478_v31, %v1482_v28  ;;  %v1491_v36 = vrot.slane %v1478_v31, %v1490_v32  ;;  %v1487_v37 = vrot.slane %v1478_v31, %v1486_v33 }
 0xaa2   : > { %1801 = vmatprep.mubr.bf16.mxu1 %v3464_v10  ;;  %1844 = vmatprep.mubr.bf16.mxu0 %v3464_v10  ;;  %v3326_v10 = vld [vmem:[%s4155_s18 + $0x60] sm:$0xff]  }
 0xaa4   : > { %1772 = vmatpush1.bf16.msra.mxu1 %v2957_v41  ;;  %1815 = vmatpush1.bf16.msra.mxu0 %v2959_v42 }
 0xaa5   : > { %1773 = vmatprep.subr.bf16.mxu1 %v2966_v43  ;;  %1816 = vmatprep.subr.bf16.mxu0 %v2968_v44 }
 0xaa8   : > { %1774 = vmatpush1.bf16.msra.mxu1 %v2965_v49  ;;  %1817 = vmatpush1.bf16.msra.mxu0 %v2967_v50 }
 0xaa9   : > { %1775 = vmatprep.subr.bf16.mxu1 %v2974_v51  ;;  %1818 = vmatprep.subr.bf16.mxu0 %v2976_v52 }
 0xaac   : > { %1776 = vmatpush1.bf16.msra.mxu1 %v2973_v53  ;;  %1819 = vmatpush1.bf16.msra.mxu0 %v2975_v54 }
 0xaad   : > { %3088 = vmatprep.subr.bf16.mxu1 %v3310_v55  ;;  %3110 = vmatprep.subr.bf16.mxu0 %v3311_v56 }
 0xaaf   : > { %2979 = vmatmul.mubr.msk.bf16.vlgmr.msra.gmra.mrb[20].mxu1 %vm806_vm1, %v1477_v30  ;;  %2980 = vmatmul.mubr.msk.bf16.vlgmr.msra.gmra.mrb[20].mxu0 %vm806_vm1, %v1477_v30  ;;  %v1494_v30 = vsub.s32 3, %v1481_v27 }
 0xab0   : > { %3089 = vmatpush3.bf16.msra.mxu1 %v3312_v57  ;;  %3111 = vmatpush3.bf16.msra.mxu0 %v3313_v58 }
 0xab1   : > { %3090 = vmatprep.subr.bf16.mxu1 %v3314_v59  ;;  %3112 = vmatprep.subr.bf16.mxu0 %v3315_v60  ;;  %v1495_v38 = vrot.slane %v1478_v31, %v1494_v30 }
 0xab4   : > { %3091 = vmatpush3.bf16.msra.mxu1 %v3316_v61  ;;  %3113 = vmatpush3.bf16.msra.mxu0 %v3317_v62 }
 0xab5   : > { %3092 = vmatprep.subr.bf16.mxu1 %v3318_v63  ;;  %3114 = vmatprep.subr.bf16.mxu0 %v3319_v0  ;;  %v1498_v63 = vsub.s32 4, %v1481_v27  ;;  %v1506_v0 = vsub.s32 6, %v1481_v27 }
 0xab8   : > { %3093 = vmatpush3.bf16.msra.mxu1 %v3320_v2  ;;  %3115 = vmatpush3.bf16.msra.mxu0 %v3321_v3  ;;  %v1502_v2 = vsub.s32 5, %v1481_v27  ;;  %v1510_v3 = vsub.s32 7, %v1481_v27 }
 0xab9   : > { %3094 = vmatprep.subr.bf16.mxu1 %v3322_v4  ;;  %3116 = vmatprep.subr.bf16.mxu0 %v3323_v7  ;;  %v1499_v4 = vrot.slane %v1478_v31, %v1498_v63  ;;  %v1507_v7 = vrot.slane %v1478_v31, %v1506_v0 }
 0xabc   : > { %3095 = vmatpush3.bf16.msra.mxu1 %v3324_v8  ;;  %3117 = vmatpush3.bf16.msra.mxu0 %v3325_v9  ;;  %v1503_v8 = vrot.slane %v1478_v31, %v1502_v2 }
 0xabd   : > { %3096 = vmatprep.subr.bf16.mxu1 %v3326_v10  ;;  %3118 = vmatprep.subr.bf16.mxu0 %v3327_v11  ;;  %v1511_v10 = vrot.slane %v1478_v31, %v1510_v3 }
 0xac0   : > { %3097 = vmatpush3.bf16.msra.mxu1 %v3328_v5  ;;  %3119 = vmatpush3.bf16.msra.mxu0 %v3329_v6 }
 0xac1   : > { %3098 = vmatprep.subr.bf16.mxu1 %v3330_v12  ;;  %3120 = vmatprep.subr.bf16.mxu0 %v3331_v13 }
 0xac4   : > { %3099 = vmatpush3.bf16.msra.mxu1 %v3332_v14  ;;  %3121 = vmatpush3.bf16.msra.mxu0 %v3333_v15 }
 0xac5   : > { %3100 = vmatprep.subr.bf16.mxu1 %v3334_v16  ;;  %3122 = vmatprep.subr.bf16.mxu0 %v3335_v17 }
 0xac8   : > { %3101 = vmatpush3.bf16.msra.mxu1 %v3336_v18  ;;  %3123 = vmatpush3.bf16.msra.mxu0 %v3337_v19 }
 0xac9   : > { %3102 = vmatprep.subr.bf16.mxu1 %v3338_v20  ;;  %3124 = vmatprep.subr.bf16.mxu0 %v3339_v21 }
 0xacc   : > { %3103 = vmatpush3.bf16.msra.mxu1 %v3340_v22  ;;  %3125 = vmatpush3.bf16.msra.mxu0 %v3341_v23 }
 0xacd   : > { %3132 = vmatprep.subr.bf16.mxu1 %v3342_v24  ;;  %3154 = vmatprep.subr.bf16.mxu0 %v3343_v25 }
 0xb72   : > { %v1717_v39 = vpop.f32.mrb[16].mxu1  ;;  %v1760_v40 = vpop.f32.mrb[16].mxu0 }
 0xb73   : > { %v1718_v41 = vadd.f32 %v1717_v39, %v1483_v35  ;;  %v1761_v42 = vadd.f32 %v1760_v40, %v1491_v36  ;;  %v1719_v43 = vpop.f32.mrb[17].mxu1  ;;  %v1762_v44 = vpop.f32.mrb[17].mxu0 }
 0xb74   : > { %v1720_v45 = vadd.f32 %v1719_v43, %v1487_v37  ;;  %v1763_v46 = vadd.f32 %v1762_v44, %v1495_v38  ;;  %v1721_v47 = vpop.f32.mrb[18].mxu1  ;;  %v1764_v48 = vpop.f32.mrb[18].mxu0 }
 0xb75   : > { %v1871_v49 = vmul.f32 0.70710677, %v1718_v41  ;;  %v1873_v50 = vmul.f32 0.70710677, %v1761_v42  ;;  %v1722_v53 = vadd.f32 %v1721_v47, %v1483_v35  ;;  %v1765_v54 = vadd.f32 %v1764_v48, %v1491_v36  ;;  %v1723_v55 = vpop.f32.mrb[19].mxu1  ;;  %v1766_v56 = vpop.f32.mrb[19].mxu0 }
 0xb76   : > { %v1872_v51 = vmul.f32 0.70710677, %v1720_v45  ;;  %v1874_v52 = vmul.f32 0.70710677, %v1763_v46  ;;  %v1724_v57 = vadd.f32 %v1723_v55, %v1487_v37  ;;  %v1767_v58 = vadd.f32 %v1766_v56, %v1495_v38 }
 0xb77   : > { %3402 = verf.f32 %v1871_v49  ;;  %v1879_v59 = vmul.f32 0.70710677, %v1722_v53  ;;  %v1881_v60 = vmul.f32 0.70710677, %v1765_v54  ;;  %v1855_v5 = vmul.f32 0.5, %v1718_v41 }
 0xb78   : > { %3404 = verf.f32 %v1873_v50  ;;  %v1880_v61 = vmul.f32 0.70710677, %v1724_v57  ;;  %v1882_v62 = vmul.f32 0.70710677, %v1767_v58  ;;  %v1857_v6 = vmul.f32 0.5, %v1761_v42 }
 0xb79   : > { %3406 = verf.f32 %v1872_v51  ;;  %v1856_v22 = vmul.f32 0.5, %v1720_v45  ;;  %v1858_v24 = vmul.f32 0.5, %v1763_v46  ;;  %v1863_v31 = vmul.f32 0.5, %v1722_v53 }
 0xb7a   : > { %3408 = verf.f32 %v1874_v52  ;;  %v1865_v33 = vmul.f32 0.5, %v1765_v54  ;;  %v1864_v39 = vmul.f32 0.5, %v1724_v57  ;;  %v1866_v40 = vmul.f32 0.5, %v1767_v58 }
 0xb7b   : > { %3410 = verf.f32 %v1879_v59 }
 0xb7c   : > { %3412 = verf.f32 %v1881_v60 }
 0xb7d   : > { %3414 = verf.f32 %v1880_v61 }
 0xb7e   : > { %3416 = verf.f32 %v1882_v62 }
 0xb81   : > { %v3403_v9 = vpop.eup %3402 }
 0xb82   : > { %v3405_v11 = vpop.eup %3404  ;;  %v1803_v12 = vpop.f32.mrb[20].mxu1  ;;  %v1903_v15 = vadd.f32 1.0, %v3403_v9 }
 0xb83   : > { %v1846_v13 = vpop.f32.mrb[20].mxu0  ;;  %v3407_v14 = vpop.eup %3406  ;;  %v1905_v16 = vadd.f32 1.0, %v3405_v11  ;;  %v3981_v17 = vadd.f32 %v1803_v12, %v1499_v4  ;;  %v3344_v11 = vld [vmem:[%s4155_s18 + $0x100] sm:$0xff]   ;;  %v3349_v12 = vld [vmem:[%s4155_s18 + $0x188] sm:$0xff]  }
 0xb84   : > { %v3983_v18 = vadd.f32 %v1846_v13, %v1507_v7  ;;  %v1805_v19 = vpop.f32.mrb[21].mxu1  ;;  %v1848_v20 = vpop.f32.mrb[21].mxu0  ;;  %v1904_v23 = vadd.f32 1.0, %v3407_v14  ;;  %v1919_v43 = vmul.f32 %v1903_v15, %v1855_v5  ;;  %v3350_v13 = vld [vmem:[%s4155_s18 + $0x150] sm:$0xff]  }
 0xb85   : > { %v3409_v21 = vpop.eup %3408  ;;  %v3985_v25 = vadd.f32 %v1805_v19, %v1503_v8  ;;  %v1807_v26 = vpop.f32.mrb[22].mxu1  ;;  %v3987_v30 = vadd.f32 %v1848_v20, %v1511_v10  ;;  %v1875_v41 = vmul.f32 0.70710677, %v3981_v17  ;;  %v1921_v44 = vmul.f32 %v1905_v16, %v1857_v6  ;;  %v3348_v6 = vld [vmem:[%s4155_s18 + $0x108] sm:$0xff]   ;;  %v3351_v14 = vld [vmem:[%s4155_s18 + $0x1d0] sm:$0xff]  }
 0xb86   : > { %v1850_v27 = vpop.f32.mrb[22].mxu0  ;;  %v3411_v28 = vpop.eup %3410  ;;  %v1906_v32 = vadd.f32 1.0, %v3409_v21  ;;  %v1877_v46 = vmul.f32 0.70710677, %v3983_v18  ;;  %v1920_v48 = vmul.f32 %v1904_v23, %v1856_v22  ;;  %v1808_v58 = vadd.f32 %v1807_v26, %v1499_v4  ;;  %v3345_v4 = vld [vmem:[%s4155_s18 + $0x180] sm:$0xff]   ;;  %v3352_v19 = vld [vmem:[%s4155_s18 + $0x110] sm:$0xff]  }
 0xb87   : > { %v1809_v35 = vpop.f32.mrb[23].mxu1  ;;  %v1852_v36 = vpop.f32.mrb[23].mxu0  ;;  %v1911_v38 = vadd.f32 1.0, %v3411_v28  ;;  %v1876_v51 = vmul.f32 0.70710677, %v3985_v25  ;;  %3418 = verf.f32 %v1875_v41  ;;  %v1851_v61 = vadd.f32 %v1850_v27, %v1507_v7  ;;  %v3353_v20 = vld [vmem:[%s4155_s18 + $0x190] sm:$0xff]  }
 0xb88   : > { %v3413_v37 = vpop.eup %3412  ;;  %v1922_v52 = vmul.f32 %v1906_v32, %v1858_v24  ;;  %v1878_v55 = vmul.f32 0.70710677, %v3987_v30  ;;  %3420 = verf.f32 %v1877_v46  ;;  %v1883_v62 = vmul.f32 0.70710677, %v1808_v58  ;;  %v3354_v22 = vld [vmem:[%s4155_s18 + $0x158] sm:$0xff]  }
 0xb89   : > { %v3415_v42 = vpop.eup %3414  ;;  %v1913_v45 = vadd.f32 1.0, %v3413_v37  ;;  %v1927_v49 = vmul.f32 %v1911_v38, %v1863_v31  ;;  %3422 = verf.f32 %v1876_v51  ;;  %v3993_v63 = vadd.f32 %v1809_v35, %v1503_v8  ;;  %v3346_v8 = vld [vmem:[%s4155_s18 + $0x148] sm:$0xff]   ;;  %v3355_v23 = vld [vmem:[%s4155_s18 + $0x1d8] sm:$0xff]  }
 0xb8a   : > { %v3417_v47 = vpop.eup %3416  ;;  %v1912_v50 = vadd.f32 1.0, %v3415_v42  ;;  %v3995_v0 = vadd.f32 %v1852_v36, %v1511_v10  ;;  %3424 = verf.f32 %v1878_v55  ;;  %v1885_v2 = vmul.f32 0.70710677, %v1851_v61  ;;  %v3347_v10 = vld [vmem:[%s4155_s18 + $0x1c8] sm:$0xff]  }
 0xb8b   : > { %v1929_v53 = vmul.f32 %v1913_v45, %v1865_v33  ;;  %v1914_v54 = vadd.f32 1.0, %v3417_v47  ;;  %v2063_v56 = vpack.c.bf16 %v1927_v49, %v1919_v43  ;;  %3426 = verf.f32 %v1883_v62  ;;  %v3362_v62 = vld [vmem:[%s4155_s18 + $0x168] sm:$0xff]  }
 0xb8c   : > { %v1928_v57 = vmul.f32 %v1912_v50, %v1864_v39  ;;  %v1884_v7 = vmul.f32 0.70710677, %v3993_v63  ;;  %3428 = verf.f32 %v1885_v2  ;;  %v1886_v5 = vmul.f32 0.70710677, %v3995_v0  ;;  %v3356_v39 = vld [vmem:[%s4155_s18 + $0x118] sm:$0xff]   ;;  %v3364_v2 = vld [vmem:[%s4155_s18 + $0x128] sm:$0xff]  }
 0xb8d   : > { %v2065_v59 = vpack.c.bf16 %v1929_v53, %v1921_v44  ;;  %v1930_v60 = vmul.f32 %v1914_v54, %v1866_v40  ;;  %v1859_v28 = vmul.f32 0.5, %v3981_v17  ;;  %v1861_v32 = vmul.f32 0.5, %v3983_v18  ;;  %v3357_v40 = vld [vmem:[%s4155_s18 + $0x198] sm:$0xff]   ;;  %v3359_v44 = vld [vmem:[%s4155_s18 + $0x1e0] sm:$0xff]  }
 0xb8e   : > { %v2064_v3 = vpack.c.bf16 %v1928_v57, %v1920_v48  ;;  %3430 = verf.f32 %v1884_v7  ;;  %v1860_v35 = vmul.f32 0.5, %v3985_v25  ;;  %v1867_v37 = vmul.f32 0.5, %v1808_v58  ;;  %v3358_v25 = vld [vmem:[%s4155_s18 + $0x160] sm:$0xff]   ;;  %v3369_v7 = vld [vmem:[%s4155_s18 + $0x1b0] sm:$0xff]  }
 0xb8f   : > { %v2066_v9 = vpack.c.bf16 %v1930_v60, %v1922_v52  ;;  %3432 = verf.f32 %v1886_v5  ;;  %v1862_v18 = vmul.f32 0.5, %v3987_v30  ;;  %v1869_v42 = vmul.f32 0.5, %v1851_v61  ;;  %v3361_v60 = vld [vmem:[%s4155_s18 + $0x1a0] sm:$0xff]   ;;  %v3372_v5 = vld [vmem:[%s4155_s18 + $0x138] sm:$0xff]  }
 0xb90   : > { %2494 = vmatprep.mubr.bf16.mxu1 %v2064_v3  ;;  %v1868_v48 = vmul.f32 0.5, %v3993_v63  ;;  %v1870_v51 = vmul.f32 0.5, %v3995_v0  ;;  %v3363_v63 = vld [vmem:[%s4155_s18 + $0x1e8] sm:$0xff]  }
 0xb91   : > { %2535 = vmatprep.mubr.bf16.mxu0 %v2066_v9  ;;  %2495 = vmatmul.mubr.bf16.vlgmr.msra.gmra.mrb[24].mxu1 %v2063_v56  ;;  %v3419_v15 = vpop.eup %3418  ;;  %v3360_v56 = vld [vmem:[%s4155_s18 + $0x120] sm:$0xff]   ;;  %v3365_v3 = vld [vmem:[%s4155_s18 + $0x1a8] sm:$0xff]   ;;  %v3366_v9 = vld [vmem:[%s4155_s18 + $0x170] sm:$0xff]  }
 0xb92   : > { %2536 = vmatmul.mubr.bf16.vlgmr.msra.gmra.mrb[24].mxu0 %v2065_v59  ;;  %3133 = vmatpush3.bf16.msra.mxu1 %v3344_v11  ;;  %v3421_v16 = vpop.eup %3420  ;;  %v1907_v26 = vadd.f32 1.0, %v3419_v15  ;;  %v3367_v11 = vld [vmem:[%s4155_s18 + $0x1f0] sm:$0xff]  }
 0xb93   : > { %3155 = vmatpush3.bf16.msra.mxu0 %v3345_v4  ;;  %3134 = vmatprep.subr.bf16.mxu1 %v3346_v8  ;;  %v3423_v21 = vpop.eup %3422  ;;  %v1909_v31 = vadd.f32 1.0, %v3421_v16  ;;  %v3368_v4 = vld [vmem:[%s4155_s18 + $0x130] sm:$0xff]   ;;  %v3370_v8 = vld [vmem:[%s4155_s18 + $0x178] sm:$0xff]  }
 0xb94   : > { %3156 = vmatprep.subr.bf16.mxu0 %v3347_v10  ;;  %v3425_v24 = vpop.eup %3424  ;;  %v1908_v36 = vadd.f32 1.0, %v3423_v21  ;;  %v1923_v46 = vmul.f32 %v1907_v26, %v1859_v28  ;;  %v3371_v10 = vld [vmem:[%s4155_s18 + $0x1f8] sm:$0xff]  }
 0xb95   : > { %v3427_v27 = vpop.eup %3426  ;;  %v1910_v41 = vadd.f32 1.0, %v3425_v24  ;;  %v1925_v30 = vmul.f32 %v1909_v31, %v1861_v32 }
 0xb96   : > { %3135 = vmatpush3.bf16.msra.mxu1 %v3348_v6  ;;  %v3429_v33 = vpop.eup %3428  ;;  %v1915_v38 = vadd.f32 1.0, %v3427_v27  ;;  %v1924_v53 = vmul.f32 %v1908_v36, %v1860_v35  ;;  %v3373_v6 = vld [vmem:[%s4155_s18 + $0x1b8] sm:$0xff]  }
 0xb97   : > { %3157 = vmatpush3.bf16.msra.mxu0 %v3349_v12  ;;  %3136 = vmatprep.subr.bf16.mxu1 %v3350_v13  ;;  %v1917_v43 = vadd.f32 1.0, %v3429_v33  ;;  %v1926_v57 = vmul.f32 %v1910_v41, %v1862_v18 }
 0xb98   : > { %3158 = vmatprep.subr.bf16.mxu0 %v3351_v14  ;;  %v3431_v17 = vpop.eup %3430  ;;  %v1931_v47 = vmul.f32 %v1915_v38, %v1867_v37  ;;  %v2981_v14 = vld [vmem:[%s4156_s19] ss:$0 sm:$0xff] }
 0xb99   : > { %v3433_v45 = vpop.eup %3432  ;;  %v1916_v49 = vadd.f32 1.0, %v3431_v17  ;;  %v1933_v50 = vmul.f32 %v1917_v43, %v1869_v42 }
 0xb9a   : > { %3137 = vmatpush3.bf16.msra.mxu1 %v3352_v19  ;;  %v1918_v52 = vadd.f32 1.0, %v3433_v45  ;;  %v2067_v54 = vpack.c.bf16 %v1931_v47, %v1923_v46 }
 0xb9b   : > { %3159 = vmatpush3.bf16.msra.mxu0 %v3353_v20  ;;  %3138 = vmatprep.subr.bf16.mxu1 %v3354_v22  ;;  %v1932_v55 = vmul.f32 %v1916_v49, %v1868_v48  ;;  %v2069_v58 = vpack.c.bf16 %v1933_v50, %v1925_v30 }
 0xb9c   : > { %3160 = vmatprep.subr.bf16.mxu0 %v3355_v23  ;;  %v1934_v59 = vmul.f32 %v1918_v52, %v1870_v51 }
 0xb9d   : > { %v2068_v61 = vpack.c.bf16 %v1932_v55, %v1924_v53 }
 0xb9e   : > { %3139 = vmatpush3.bf16.msra.mxu1 %v3356_v39  ;;  %v2070_v0 = vpack.c.bf16 %v1934_v59, %v1926_v57 }
 0xb9f   : > { %3161 = vmatpush3.bf16.msra.mxu0 %v3357_v40  ;;  %3140 = vmatprep.subr.bf16.mxu1 %v3358_v25 }
 0xba0   : > { %3162 = vmatprep.subr.bf16.mxu0 %v3359_v44  ;;  %2576 = vmatprep.mubr.bf16.mxu1 %v2068_v61  ;;  %v3376_v61 = vld [vmem:[%s752_s26 + $0x10] sm:$0xff]  }
 0xba1   : > { %2617 = vmatprep.mubr.bf16.mxu0 %v2070_v0 }
 0xba2   : > { %3141 = vmatpush3.bf16.msra.mxu1 %v3360_v56 }
 0xba3   : > { %3163 = vmatpush3.bf16.msra.mxu0 %v3361_v60  ;;  %3142 = vmatprep.subr.bf16.mxu1 %v3362_v62  ;;  %v3375_v60 = vld [vmem:[%s752_s26 + $0x8] sm:$0xff]   ;;  %v3377_v62 = vld [vmem:[%s752_s26 + $0x18] sm:$0xff]  }
 0xba4   : > { %3164 = vmatprep.subr.bf16.mxu0 %v3363_v63 }
 0xba6   : > { %3143 = vmatpush3.bf16.msra.mxu1 %v3364_v2 }
 0xba7   : > { %3165 = vmatpush3.bf16.msra.mxu0 %v3365_v3  ;;  %3144 = vmatprep.subr.bf16.mxu1 %v3366_v9 }
 0xba8   : > { %3166 = vmatprep.subr.bf16.mxu0 %v3367_v11 }
 0xbaa   : > { %3145 = vmatpush3.bf16.msra.mxu1 %v3368_v4 }
 0xbab   : > { %3167 = vmatpush3.bf16.msra.mxu0 %v3369_v7  ;;  %3146 = vmatprep.subr.bf16.mxu1 %v3370_v8  ;;  %v3046_v7 = vld [vmem:[%s4152_s15 + $0x4] ss:$0 sm:$0xff] }
 0xbac   : > { %3168 = vmatprep.subr.bf16.mxu0 %v3371_v10 }
 0xbae   : > { %3147 = vmatpush3.bf16.msra.mxu1 %v3372_v5 }
 0xbaf   : > { %3169 = vmatpush3.bf16.msra.mxu0 %v3373_v6  ;;  %3253 = vmatprep.subr.bf16.mxu1 %v3462_v1 }
 0xbb1   : > { %2577 = vmatmul.mubr.bf16.vlgmr.msra.gmra.mrb[28].mxu1 %v2067_v54 }
 0xbb2   : > { %2618 = vmatmul.mubr.bf16.vlgmr.msra.gmra.mrb[28].mxu0 %v2069_v58  ;;  %3261 = vmatprep.mubr.msk.bf16.mxu1 %vm3463_vm0, %v3462_v1 }
 0xc64   : > { %v3104_v12 = vpop.f32.mrb[24].mxu1 }
 0xc65   : > { %v3126_v13 = vpop.f32.mrb[24].mxu0  ;;  %v3105_v15 = vpop.f32.mrb[25].mxu1 }
 0xc66   : > { %v3127_v16 = vpop.f32.mrb[25].mxu0  ;;  %v3106_v19 = vadd.f32 %v3105_v15, %v3104_v12  ;;  %v3107_v21 = vpop.f32.mrb[26].mxu1 }
 0xc67   : > { %v3128_v20 = vadd.f32 %v3127_v16, %v3126_v13  ;;  %v3129_v22 = vpop.f32.mrb[26].mxu0  ;;  %v3108_v23 = vpop.f32.mrb[27].mxu1 }
 0xc68   : > { %v3130_v24 = vpop.f32.mrb[27].mxu0  ;;  %v2497_v26 = vadd.f32 %v3106_v19, %v2981_v14  ;;  %v3109_v27 = vadd.f32 %v3108_v23, %v3107_v21 }
 0xc69   : > { %v3131_v28 = vadd.f32 %v3130_v24, %v3129_v22 }
 0xc6a   : > { %v2538_v32 = vadd.f32 %v3128_v20, %v2497_v26  ;;  %v2500_v31 = vadd.f32 %v3109_v27, %v2981_v14 }
 0xc6c   : > { %v2541_v33 = vadd.f32 %v3131_v28, %v2500_v31 }
 0xc84   : > { %v3148_v35 = vpop.f32.mrb[28].mxu1 }
 0xc85   : > { %v3170_v36 = vpop.f32.mrb[28].mxu0  ;;  %v3149_v37 = vpop.f32.mrb[29].mxu1 }
 0xc86   : > { %v3150_v38 = vadd.f32 %v3149_v37, %v3148_v35  ;;  %v3171_v39 = vpop.f32.mrb[29].mxu0  ;;  %v3151_v40 = vpop.f32.mrb[30].mxu1 }
 0xc87   : > { %v3172_v17 = vadd.f32 %v3171_v39, %v3170_v36  ;;  %v3173_v18 = vpop.f32.mrb[30].mxu0  ;;  %v3152_v41 = vpop.f32.mrb[31].mxu1 }
 0xc88   : > { %v2579_v42 = vadd.f32 %v3150_v38, %v2538_v32  ;;  %v3153_v43 = vadd.f32 %v3152_v41, %v3151_v40  ;;  %v3174_v25 = vpop.f32.mrb[31].mxu0 }
 0xc89   : > { %v3175_v44 = vadd.f32 %v3174_v25, %v3173_v18 }
 0xc8a   : > { %v2620_v45 = vadd.f32 %v3172_v17, %v2579_v42  ;;  %v2582_v46 = vadd.f32 %v3153_v43, %v2541_v33 }
 0xc8c   : > { %v2623_v47 = vadd.f32 %v3175_v44, %v2582_v46  ;;  %v2626_v48 = vadd.f32 %v2620_v45, %v3842_v34 }
 0xc8e   : > { %v2630_v49 = vsel %vm806_vm1, %v2626_v48, 0.0  ;;  %v2627_v30 = vadd.f32 %v2623_v47, %v3844_v29  ;;  %v3374_v29 = vld [vmem:[%s752_s26] sm:$0xff]  }
 0xc8f   : > { %2631 = vadd.xlane.f32.xlu0 %v2630_v49  ;;  %3254 = vmatpush3.bf16.msra.mxu1 %v3374_v29 }
 0xc90   : > { %v2633_v50 = vsel %vm806_vm1, %v2627_v30, 0.0  ;;  %3255 = vmatprep.subr.bf16.mxu1 %v3462_v1 }
 0xc91   : > { %2634 = vadd.xlane.f32.xlu1 %v2633_v50 }
 0xc93   : > { %3256 = vmatpush3.bf16.msra.mxu1 %v3375_v60 }
 0xc94   : > { %3257 = vmatprep.subr.bf16.mxu1 %v3462_v1 }
 0xc97   : > { %3258 = vmatpush3.bf16.msra.mxu1 %v3376_v61 }
 0xc98   : > { %3259 = vmatprep.subr.bf16.mxu1 %v3462_v1  ;;  %v3047_v1 = vld [vmem:[%s4152_s15 + $0x5] ss:$0 sm:$0xff] }
 0xc9b   : > { %3260 = vmatpush3.bf16.msra.mxu1 %v3377_v62 }
 0xd1c   : > { %v2632_v51 = vpop.xlane.xlu0 %2631 }
 0xd1d   : > { %v2636_v52 = vmul.f32 0.015625, %v2632_v51 }
 0xd1e   : > { %v2635_v53 = vpop.xlane.xlu1 %2634 }
 0xd1f   : > { %v2638_v54 = vsub.f32 %v2626_v48, %v2636_v52  ;;  %v2637_v55 = vmul.f32 0.015625, %v2635_v53 }
 0xd21   : > { %v2639_v56 = vsub.f32 %v2627_v30, %v2637_v55  ;;  %v2640_v57 = vmul.f32 %v2638_v54, %v2638_v54 }
 0xd23   : > { %v2642_v58 = vsel %vm806_vm1, %v2640_v57, 0.0  ;;  %v2641_v59 = vmul.f32 %v2639_v56, %v2639_v56 }
 0xd24   : > { %2643 = vadd.xlane.f32.xlu0 %v2642_v58 }
 0xd25   : > { %v2645_v34 = vsel %vm806_vm1, %v2641_v59, 0.0 }
 0xd26   : > { %2646 = vadd.xlane.f32.xlu1 %v2645_v34 }
 0xdb1   : > { %v2644_v63 = vpop.xlane.xlu0 %2643 }
 0xdb2   : > { %v2648_v0 = vmul.f32 0.015625, %v2644_v63 }
 0xdb3   : > { %v2647_v2 = vpop.xlane.xlu1 %2646 }
 0xdb4   : > { %v2650_v3 = vadd.f32 1e-05, %v2648_v0  ;;  %v2649_v9 = vmul.f32 0.015625, %v2647_v2 }
 0xdb6   : > { %3434 = vrsqrt.f32 %v2650_v3  ;;  %v2651_v11 = vadd.f32 1e-05, %v2649_v9 }
 0xdb8   : > { %3436 = vrsqrt.f32 %v2651_v11 }
 0xdc0   : > { %v3435_v4 = vpop.eup %3434 }
 0xdc1   : > { %v2654_v8 = vmul.f32 %v3435_v4, %v2638_v54 }
 0xdc2   : > { %v3437_v10 = vpop.eup %3436 }
 0xdc3   : > { %v2660_v5 = vmul.f32 %v3046_v7, %v2654_v8  ;;  %v2655_v6 = vmul.f32 %v3437_v10, %v2639_v56 }
 0xdc5   : > { %v2661_v12 = vmul.f32 %v3046_v7, %v2655_v6  ;;  %v2666_v13 = vadd.f32 %v3047_v1, %v2660_v5 }
 0xdc7   : > { %v2667_v14 = vadd.f32 %v3047_v1, %v2661_v12 }
 0xdc9   : > { %v2676_v15 = vpack.c.bf16 %v2667_v14, %v2666_v13 }
 0xdcb   : > { %3262 = vmatmul.mubr.msk.bf16.vlgmr.msra.gmra.mrb[32].mxu1 %vm806_vm1, %v2676_v15 }
 0xe9e   : > { %v2738_v16 = vpop.f32.mrb[32].mxu1 }
 0xe9f   : > { %2745 = vst.msk [vmem:[%s761_s2] sm:$0xff] %vm1246_vm3, %v2738_v16  ;;  %v3263_v19 = vpop.f32.mrb[33].mxu1 }
 0xea0   : > { %v2741_v20 = vpop.f32.mrb[34].mxu1 }
 0xea1   : > { %2746 = vst.msk [vmem:[%s761_s2 + $0x8] sm:$0xff] %vm1246_vm3, %v2741_v20  ;;  %v3264_v21 = vpop.f32.mrb[35].mxu1 }
 0xea2 PF: > { %s30_s6 = sadd.s32 1, %s3460_s6   ;;  %s4168_s21 = smov %s3456_s1 }
 0xea3   : > { %p27_p5 = scmp.ge.s32.totalorder %s30_s6, 4   ;;  %s4169_s1 = smov %s4171_s22 }
 0xea5   :  { %29 = sbr.rel (!%p27_p5) target bundleno = 6 (0x6), region = 145 }

</bundles_post_ra>
